<compile_context>
chip_gen: v7x
topology: tpu7x:2x2x1
jax: 0.10.0
libtpu: 0.0.40
codegen_flags: <defaults>
</compile_context>

<pallas_src>
import jax
import jax.numpy as jnp
from jax import lax
from jax.experimental import pallas as pl
from jax.experimental.pallas import tpu as pltpu


# ------------------------------- Pallas kernel ------------------------------ #

def _lstm_model_kernel(x_ref, wih_ref, whh_ref, b_ref,
                       w1_ref, b1_ref, w2_ref, b2_ref,
                       seq_ref, norm_ref,
                       xg_sc):
    """Fused LSTM + MLP head (one batch tile per grid program).

    x_ref   : (Bt, T, I)     batch-major input tile
    wih_ref : (I, 4H)        LSTM input weights, gate order [i|f|g|o], i/f/o cols pre-scaled by 0.5
    whh_ref : (H, 4H)        LSTM hidden weights, same pre-scaling
    b_ref   : (1, 1, 4H)     (b_ih + b_hh), same pre-scaling
    w1_ref  : (H, Lin), b1_ref : (1, Lin)
    w2_ref  : (Lin, O), b2_ref : (1, O)
    seq_ref : (Bt, T, H)     full hidden-state sequence (LSTM output), batch-major
    norm_ref: (Bt, O)        L2-normalized head output
    xg_sc   : (Bt, T, 4H)    VMEM scratch: precomputed input projections
    """
    Bt, T, _ = x_ref.shape
    H = whh_ref.shape[0]

    # 1) Input projection for ALL timesteps in one MXU pass, directly on (Bt,T,I).
    #    4H = 128 lanes -> lane dense.
    xg = lax.dot_general(
        x_ref[...], wih_ref[...],
        dimension_numbers=(((2,), (0,)), ((), ())),
        preferred_element_type=jnp.float32)              # (Bt, T, 4H)
    xg_sc[...] = xg + b_ref[...]

    # Loop-invariant values, hoisted out of the recurrence.
    whh = whh_ref[...]                                   # (H, 4H)
    lane = lax.broadcasted_iota(jnp.int32, (1, 4 * H), 1)
    is_tanh_gate = jnp.logical_and(lane >= 2 * H, lane < 3 * H)
    # sigmoid(z) = 0.5 * tanh(0.5 z) + 0.5 ; the 0.5 pre-scale is already folded
    # into the i/f/o weight columns in the wrapper.
    post_scale = jnp.where(is_tanh_gate, 1.0, 0.5).astype(jnp.float32)
    post_shift = jnp.where(is_tanh_gate, 0.0, 0.5).astype(jnp.float32)

    # 2) Sequential recurrence, fully unrolled (T is small & static); h, c stay in
    #    vregs as plain carried values -- no VMEM state round trips.
    h = jnp.zeros((Bt, H), jnp.float32)
    c = jnp.zeros((Bt, H), jnp.float32)
    for t in range(T):                                   # static indices everywhere
        g = xg_sc[:, t, :] + jnp.dot(h, whh, preferred_element_type=jnp.float32)
        act = jnp.tanh(g) * post_scale + post_shift      # one full-vreg tanh
        i_g = act[:, 0 * H:1 * H]
        f_g = act[:, 1 * H:2 * H]
        g_g = act[:, 2 * H:3 * H]
        o_g = act[:, 3 * H:4 * H]
        c = f_g * c + i_g * g_g
        h = o_g * jnp.tanh(c)
        seq_ref[:, t, :] = h                             # single store per step

    # 3) Head on the final hidden state: Linear -> ReLU -> Linear -> L2 normalize.
    lin = jnp.dot(h, w1_ref[...], preferred_element_type=jnp.float32) + b1_ref[...]
    lin = jnp.maximum(lin, 0.0)
    fin = jnp.dot(lin, w2_ref[...], preferred_element_type=jnp.float32) + b2_ref[...]
    ss = jnp.sum(fin * fin, axis=1, keepdims=True)
    # torch F.normalize: x / max(||x||, 1e-12)  ==  x * rsqrt(max(||x||^2, 1e-24))
    norm_ref[...] = fin * lax.rsqrt(jnp.maximum(ss, 1e-24))


# ------------------------------ Pallas wrapper ------------------------------ #

def lstm_model_forward(x, p):
    """x: (B, T, input_size); returns (final_output_norm, lstm_output) like the module."""
    B, T, I = x.shape
    H = p["w_hh"].shape[1]
    Lin = p["w1"].shape[0]
    O = p["w2"].shape[0]

    # Fold the 0.5 sigmoid pre-scale into the i/f/o gate columns (gate order [i|f|g|o]).
    gate_pre = jnp.concatenate([jnp.full((H,), 0.5, jnp.float32),
                                jnp.full((H,), 0.5, jnp.float32),
                                jnp.ones((H,), jnp.float32),
                                jnp.full((H,), 0.5, jnp.float32)])     # (4H,)

    x_f = x.astype(jnp.float32)                                        # (B, T, I) -- no transpose
    wih_t = (p["w_ih"].T.astype(jnp.float32) * gate_pre[None, :])      # (I, 4H)
    whh_t = (p["w_hh"].T.astype(jnp.float32) * gate_pre[None, :])      # (H, 4H)
    b = ((p["b_ih"] + p["b_hh"]).astype(jnp.float32) * gate_pre).reshape(1, 1, 4 * H)
    w1_t = p["w1"].T.astype(jnp.float32)                               # (H, Lin)
    b1 = p["b1"].reshape(1, Lin).astype(jnp.float32)
    w2_t = p["w2"].T.astype(jnp.float32)                               # (Lin, O)
    b2 = p["b2"].reshape(1, O).astype(jnp.float32)

    # Batch-tile grid axis (independent programs -> v7x 2-TC sharding). At toy B<=8
    # this is a single program; for larger B use multiples of 8 sublanes per tile.
    if B <= 8:
        b_tile = B
    elif B % 8 == 0:
        b_tile = 8
    else:
        b_tile = B
    grid = (B // b_tile,)

    flops = (2 * B * T * I * 4 * H          # input projection
             + 2 * T * B * H * 4 * H        # recurrent matmuls
             + 2 * B * H * Lin + 2 * B * Lin * O)
    transcendentals = T * B * (4 * H + H)   # tanh(gates) + tanh(c) per step
    bytes_accessed = 4 * (B * T * I + I * 4 * H + H * 4 * H + 4 * H
                          + H * Lin + Lin + Lin * O + O
                          + B * T * H + B * O)

    seq_out, norm_out = pl.pallas_call(
        _lstm_model_kernel,
        grid=grid,
        out_shape=(jax.ShapeDtypeStruct((B, T, H), jnp.float32),
                   jax.ShapeDtypeStruct((B, O), jnp.float32)),
        in_specs=[
            pl.BlockSpec((b_tile, T, I), lambda i: (i, 0, 0)),   # x (batch tiled)
            pl.BlockSpec((I, 4 * H), lambda i: (0, 0)),          # W_ih^T (full)
            pl.BlockSpec((H, 4 * H), lambda i: (0, 0)),          # W_hh^T (full)
            pl.BlockSpec((1, 1, 4 * H), lambda i: (0, 0, 0)),    # bias
            pl.BlockSpec((H, Lin), lambda i: (0, 0)),            # W1^T
            pl.BlockSpec((1, Lin), lambda i: (0, 0)),            # b1
            pl.BlockSpec((Lin, O), lambda i: (0, 0)),            # W2^T
            pl.BlockSpec((1, O), lambda i: (0, 0)),              # b2
        ],
        out_specs=(
            pl.BlockSpec((b_tile, T, H), lambda i: (i, 0, 0)),   # LSTM output, (B,T,H) directly
            pl.BlockSpec((b_tile, O), lambda i: (i, 0)),         # normalized head output
        ),
        scratch_shapes=[pltpu.VMEM((b_tile, T, 4 * H), jnp.float32)],
        compiler_params=pltpu.CompilerParams(
            dimension_semantics=("parallel",)),
        cost_estimate=pl.CostEstimate(flops=flops,
                                      transcendentals=transcendentals,
                                      bytes_accessed=bytes_accessed),
    )(x_f, wih_t, whh_t, b, w1_t, b1, w2_t, b2)

    return norm_out, seq_out


# ------------------------------ Parameter init ------------------------------ #

def init_lstm_model_params(key, input_size, h_state_size, lin_size, output_size):
    """Torch-layout weights: LSTM (4H, In)/(4H, H) gate order [i|f|g|o], Linear (out, in)."""
    ks = jax.random.split(key, 8)
    s = 0.1
    return {
        "w_ih": s * jax.random.normal(ks[0], (4 * h_state_size, input_size), jnp.float32),
        "w_hh": s * jax.random.normal(ks[1], (4 * h_state_size, h_state_size), jnp.float32),
        "b_ih": s * jax.random.normal(ks[2], (4 * h_state_size,), jnp.float32),
        "b_hh": s * jax.random.normal(ks[3], (4 * h_state_size,), jnp.float32),
        "w1":   s * jax.random.normal(ks[4], (lin_size, h_state_size), jnp.float32),
        "b1":   s * jax.random.normal(ks[5], (lin_size,), jnp.float32),
        "w2":   s * jax.random.normal(ks[6], (output_size, lin_size), jnp.float32),
        "b2":   s * jax.random.normal(ks[7], (output_size,), jnp.float32),
    }


# --------------------------- Pure-JAX reference ------------------------------ #

def lstm_model_reference(x, p):
    H = p["w_hh"].shape[1]
    B = x.shape[0]

    def sigmoid(v):
        return 1.0 / (1.0 + jnp.exp(-v))

    def cell(carry, x_t):
        h, c = carry
        g = x_t @ p["w_ih"].T + h @ p["w_hh"].T + p["b_ih"] + p["b_hh"]
        i_g, f_g, g_g, o_g = jnp.split(g, 4, axis=-1)
        c = sigmoid(f_g) * c + sigmoid(i_g) * jnp.tanh(g_g)
        h = sigmoid(o_g) * jnp.tanh(c)
        return (h, c), h

    h0 = jnp.zeros((B, H), jnp.float32)
    c0 = jnp.zeros((B, H), jnp.float32)
    _, hs = lax.scan(cell, (h0, c0), jnp.swapaxes(x, 0, 1))       # (T, B, H)
    output = jnp.swapaxes(hs, 0, 1)                               # (B, T, H)

    h_last = output[:, -1, :]
    lin = jax.nn.relu(h_last @ p["w1"].T + p["b1"])
    fin = lin @ p["w2"].T + p["b2"]
    nrm = jnp.maximum(jnp.sqrt(jnp.sum(fin * fin, axis=1, keepdims=True)), 1e-12)
    return fin / nrm, output


# ----------------------------------- main ------------------------------------ #

if __name__ == "__main__":
    # Small shapes consistent with LSTM_model(input_size, h_state_size, lin_size, output_size)
    B, T = 2, 8
    input_size, h_state_size, lin_size, output_size = 4, 32, 16, 8

    key = jax.random.PRNGKey(0)
    key, kx = jax.random.split(key)
    x = jax.random.normal(kx, (B, T, input_size), jnp.float32)

    params = init_lstm_model_params(key, input_size, h_state_size, lin_size, output_size)

    norm_out, seq_out = lstm_model_forward(x, params)
    jax.block_until_ready((norm_out, seq_out))

    ref_norm, ref_seq = lstm_model_reference(x, params)
    assert norm_out.shape == (B, output_size)
    assert seq_out.shape == (B, T, h_state_size)
    assert jnp.allclose(seq_out, ref_seq, atol=1e-4, rtol=1e-4), "LSTM output mismatch"
    assert jnp.allclose(norm_out, ref_norm, atol=1e-4, rtol=1e-4), "head output mismatch"

    print("KERNEL_OK")
</pallas_src>

<mosaic_0001>
module attributes {stable_mosaic.version = 11 : i64} {
  func.func @_lstm_model_kernel(%arg0: i32, %arg1: memref<2x8x4xf32, #tpu.memory_space<vmem>>, %arg2: memref<4x128xf32, #tpu.memory_space<vmem>>, %arg3: memref<32x128xf32, #tpu.memory_space<vmem>>, %arg4: memref<1x1x128xf32, #tpu.memory_space<vmem>>, %arg5: memref<32x16xf32, #tpu.memory_space<vmem>>, %arg6: memref<1x16xf32, #tpu.memory_space<vmem>>, %arg7: memref<16x8xf32, #tpu.memory_space<vmem>>, %arg8: memref<1x8xf32, #tpu.memory_space<vmem>>, %arg9: memref<2x8x32xf32, #tpu.memory_space<vmem>>, %arg10: memref<2x8xf32, #tpu.memory_space<vmem>>, %arg11: memref<2x8x128xf32, #tpu.memory_space<vmem>>) attributes {dimension_semantics = [#tpu.dimension_semantics<parallel>], iteration_bounds = array<i64: 1>, scalar_prefetch = 0 : i64, scratch_operands = 1 : i64, tpu.core_type = #tpu.core_type<tc>, window_params = [{transform_indices = @transform_0, window_bounds = array<i64: 2, 8, 4>}, {pipeline_mode = #tpu.pipeline_mode<synchronous>, transform_indices = @transform_1, window_bounds = array<i64: 4, 128>}, {pipeline_mode = #tpu.pipeline_mode<synchronous>, transform_indices = @transform_2, window_bounds = array<i64: 32, 128>}, {pipeline_mode = #tpu.pipeline_mode<synchronous>, transform_indices = @transform_3, window_bounds = array<i64: 1, 1, 128>}, {pipeline_mode = #tpu.pipeline_mode<synchronous>, transform_indices = @transform_4, window_bounds = array<i64: 32, 16>}, {pipeline_mode = #tpu.pipeline_mode<synchronous>, transform_indices = @transform_5, window_bounds = array<i64: 1, 16>}, {pipeline_mode = #tpu.pipeline_mode<synchronous>, transform_indices = @transform_6, window_bounds = array<i64: 16, 8>}, {pipeline_mode = #tpu.pipeline_mode<synchronous>, transform_indices = @transform_7, window_bounds = array<i64: 1, 8>}, {transform_indices = @transform_8, window_bounds = array<i64: 2, 8, 32>}, {transform_indices = @transform_9, window_bounds = array<i64: 2, 8>}]} {
    %c0 = arith.constant 0 : index
    %c0_0 = arith.constant 0 : index
    %c0_1 = arith.constant 0 : index
    %0 = vector.load %arg1[%c0, %c0_0, %c0_1] : memref<2x8x4xf32, #tpu.memory_space<vmem>>, vector<2x8x4xf32>
    %c0_2 = arith.constant 0 : index
    %c0_3 = arith.constant 0 : index
    %1 = vector.load %arg2[%c0_2, %c0_3] : memref<4x128xf32, #tpu.memory_space<vmem>>, vector<4x128xf32>
    %cst = arith.constant dense<0.000000e+00> : vector<2x8x128xf32>
    %2 = tpu.matmul %0, %1, %cst {dimension_numbers = #tpu.dot_dimension_numbers<[2], [0], [0, 1], [1], [0, 0, 0, 1, 1, 1], [], []>} : vector<2x8x4xf32>, vector<4x128xf32>, vector<2x8x128xf32> -> vector<2x8x128xf32>
    %c0_4 = arith.constant 0 : index
    %c0_5 = arith.constant 0 : index
    %c0_6 = arith.constant 0 : index
    %3 = vector.load %arg4[%c0_4, %c0_5, %c0_6] : memref<1x1x128xf32, #tpu.memory_space<vmem>>, vector<1x1x128xf32>
    %4 = vector.broadcast %3 : vector<1x1x128xf32> to vector<2x8x128xf32>
    %5 = arith.addf %2, %4 : vector<2x8x128xf32>
    %c0_7 = arith.constant 0 : index
    %c0_8 = arith.constant 0 : index
    %c0_9 = arith.constant 0 : index
    %6 = vector.load %arg11[%c0_7, %c0_8, %c0_9] : memref<2x8x128xf32, #tpu.memory_space<vmem>>, vector<2x8x128xf32>
    tpu.vector_store %arg11[%c0_7, %c0_8, %c0_9], %5 {strides = array<i32>} : memref<2x8x128xf32, #tpu.memory_space<vmem>>, vector<2x8x128xf32>,
    %c0_10 = arith.constant 0 : index
    %c0_11 = arith.constant 0 : index
    %7 = vector.load %arg3[%c0_10, %c0_11] : memref<32x128xf32, #tpu.memory_space<vmem>>, vector<32x128xf32>
    %8 = tpu.iota {dimensions = array<i32: 1>} : vector<1x128xi32>
    %c64_i32 = arith.constant 64 : i32
    %9 = vector.broadcast %c64_i32 : i32 to vector<1x128xi32>
    %10 = arith.cmpi sge, %8, %9 : vector<1x128xi32>
    %c96_i32 = arith.constant 96 : i32
    %11 = vector.broadcast %c96_i32 : i32 to vector<1x128xi32>
    %12 = arith.cmpi slt, %8, %11 : vector<1x128xi32>
    %13 = arith.andi %10, %12 : vector<1x128xi1>
    %cst_12 = arith.constant 1.000000e+00 : f32
    %cst_13 = arith.constant 5.000000e-01 : f32
    %14 = vector.broadcast %cst_12 : f32 to vector<1x128xf32>
    %15 = vector.broadcast %cst_13 : f32 to vector<1x128xf32>
    %16 = arith.select %13, %14, %15 : vector<1x128xi1>, vector<1x128xf32>
    %cst_14 = arith.constant 0.000000e+00 : f32
    %cst_15 = arith.constant 5.000000e-01 : f32
    %17 = vector.broadcast %cst_14 : f32 to vector<1x128xf32>
    %18 = vector.broadcast %cst_15 : f32 to vector<1x128xf32>
    %19 = arith.select %13, %17, %18 : vector<1x128xi1>, vector<1x128xf32>
    %cst_16 = arith.constant 0.000000e+00 : f32
    %20 = vector.broadcast %cst_16 : f32 to vector<2x32xf32>
    %cst_17 = arith.constant 0.000000e+00 : f32
    %21 = vector.broadcast %cst_17 : f32 to vector<2x32xf32>
    %c0_18 = arith.constant 0 : index
    %c0_19 = arith.constant 0 : index
    %c0_20 = arith.constant 0 : index
    %22 = vector.load %arg11[%c0_18, %c0_19, %c0_20] : memref<2x8x128xf32, #tpu.memory_space<vmem>>, vector<2x1x128xf32>
    %23 = vector.shape_cast %22 : vector<2x1x128xf32> to vector<2x128xf32>
    %cst_21 = arith.constant dense<0.000000e+00> : vector<2x128xf32>
    %24 = tpu.matmul %20, %7, %cst_21 {dimension_numbers = #tpu.dot_dimension_numbers<[1], [0], [0], [1], [0, 0, 1, 1], [], []>} : vector<2x32xf32>, vector<32x128xf32>, vector<2x128xf32> -> vector<2x128xf32>
    %25 = arith.addf %23, %24 : vector<2x128xf32>
    %26 = math.tanh %25 : vector<2x128xf32>
    %27 = vector.broadcast %16 : vector<1x128xf32> to vector<2x128xf32>
    %28 = arith.mulf %26, %27 : vector<2x128xf32>
    %29 = vector.broadcast %19 : vector<1x128xf32> to vector<2x128xf32>
    %30 = arith.addf %28, %29 : vector<2x128xf32>
    %31 = vector.extract_strided_slice %30 {offsets = [0, 0], sizes = [2, 32], strides = [1, 1]} : vector<2x128xf32> to vector<2x32xf32>
    %32 = vector.extract_strided_slice %30 {offsets = [0, 32], sizes = [2, 32], strides = [1, 1]} : vector<2x128xf32> to vector<2x32xf32>
    %33 = vector.extract_strided_slice %30 {offsets = [0, 64], sizes = [2, 32], strides = [1, 1]} : vector<2x128xf32> to vector<2x32xf32>
    %34 = vector.extract_strided_slice %30 {offsets = [0, 96], sizes = [2, 32], strides = [1, 1]} : vector<2x128xf32> to vector<2x32xf32>
    %35 = arith.mulf %32, %21 : vector<2x32xf32>
    %36 = arith.mulf %31, %33 : vector<2x32xf32>
    %37 = arith.addf %35, %36 : vector<2x32xf32>
    %38 = math.tanh %37 : vector<2x32xf32>
    %39 = arith.mulf %34, %38 : vector<2x32xf32>
    %c0_22 = arith.constant 0 : index
    %c0_23 = arith.constant 0 : index
    %c0_24 = arith.constant 0 : index
    %40 = vector.load %arg9[%c0_22, %c0_23, %c0_24] : memref<2x8x32xf32, #tpu.memory_space<vmem>>, vector<2x1x32xf32>
    %41 = vector.shape_cast %40 : vector<2x1x32xf32> to vector<2x32xf32>
    %42 = vector.shape_cast %39 : vector<2x32xf32> to vector<2x1x32xf32>
    tpu.vector_store %arg9[%c0_22, %c0_23, %c0_24], %42 {strides = array<i32>} : memref<2x8x32xf32, #tpu.memory_space<vmem>>, vector<2x1x32xf32>,
    %c0_25 = arith.constant 0 : index
    %c1 = arith.constant 1 : index
    %c0_26 = arith.constant 0 : index
    %43 = vector.load %arg11[%c0_25, %c1, %c0_26] : memref<2x8x128xf32, #tpu.memory_space<vmem>>, vector<2x1x128xf32>
    %44 = vector.shape_cast %43 : vector<2x1x128xf32> to vector<2x128xf32>
    %cst_27 = arith.constant dense<0.000000e+00> : vector<2x128xf32>
    %45 = tpu.matmul %39, %7, %cst_27 {dimension_numbers = #tpu.dot_dimension_numbers<[1], [0], [0], [1], [0, 0, 1, 1], [], []>} : vector<2x32xf32>, vector<32x128xf32>, vector<2x128xf32> -> vector<2x128xf32>
    %46 = arith.addf %44, %45 : vector<2x128xf32>
    %47 = math.tanh %46 : vector<2x128xf32>
    %48 = vector.broadcast %16 : vector<1x128xf32> to vector<2x128xf32>
    %49 = arith.mulf %47, %48 : vector<2x128xf32>
    %50 = vector.broadcast %19 : vector<1x128xf32> to vector<2x128xf32>
    %51 = arith.addf %49, %50 : vector<2x128xf32>
    %52 = vector.extract_strided_slice %51 {offsets = [0, 0], sizes = [2, 32], strides = [1, 1]} : vector<2x128xf32> to vector<2x32xf32>
    %53 = vector.extract_strided_slice %51 {offsets = [0, 32], sizes = [2, 32], strides = [1, 1]} : vector<2x128xf32> to vector<2x32xf32>
    %54 = vector.extract_strided_slice %51 {offsets = [0, 64], sizes = [2, 32], strides = [1, 1]} : vector<2x128xf32> to vector<2x32xf32>
    %55 = vector.extract_strided_slice %51 {offsets = [0, 96], sizes = [2, 32], strides = [1, 1]} : vector<2x128xf32> to vector<2x32xf32>
    %56 = arith.mulf %53, %37 : vector<2x32xf32>
    %57 = arith.mulf %52, %54 : vector<2x32xf32>
    %58 = arith.addf %56, %57 : vector<2x32xf32>
    %59 = math.tanh %58 : vector<2x32xf32>
    %60 = arith.mulf %55, %59 : vector<2x32xf32>
    %c0_28 = arith.constant 0 : index
    %c1_29 = arith.constant 1 : index
    %c0_30 = arith.constant 0 : index
    %61 = vector.load %arg9[%c0_28, %c1_29, %c0_30] : memref<2x8x32xf32, #tpu.memory_space<vmem>>, vector<2x1x32xf32>
    %62 = vector.shape_cast %61 : vector<2x1x32xf32> to vector<2x32xf32>
    %63 = vector.shape_cast %60 : vector<2x32xf32> to vector<2x1x32xf32>
    tpu.vector_store %arg9[%c0_28, %c1_29, %c0_30], %63 {strides = array<i32>} : memref<2x8x32xf32, #tpu.memory_space<vmem>>, vector<2x1x32xf32>,
    %c0_31 = arith.constant 0 : index
    %c2 = arith.constant 2 : index
    %c0_32 = arith.constant 0 : index
    %64 = vector.load %arg11[%c0_31, %c2, %c0_32] : memref<2x8x128xf32, #tpu.memory_space<vmem>>, vector<2x1x128xf32>
    %65 = vector.shape_cast %64 : vector<2x1x128xf32> to vector<2x128xf32>
    %cst_33 = arith.constant dense<0.000000e+00> : vector<2x128xf32>
    %66 = tpu.matmul %60, %7, %cst_33 {dimension_numbers = #tpu.dot_dimension_numbers<[1], [0], [0], [1], [0, 0, 1, 1], [], []>} : vector<2x32xf32>, vector<32x128xf32>, vector<2x128xf32> -> vector<2x128xf32>
    %67 = arith.addf %65, %66 : vector<2x128xf32>
    %68 = math.tanh %67 : vector<2x128xf32>
    %69 = vector.broadcast %16 : vector<1x128xf32> to vector<2x128xf32>
    %70 = arith.mulf %68, %69 : vector<2x128xf32>
    %71 = vector.broadcast %19 : vector<1x128xf32> to vector<2x128xf32>
    %72 = arith.addf %70, %71 : vector<2x128xf32>
    %73 = vector.extract_strided_slice %72 {offsets = [0, 0], sizes = [2, 32], strides = [1, 1]} : vector<2x128xf32> to vector<2x32xf32>
    %74 = vector.extract_strided_slice %72 {offsets = [0, 32], sizes = [2, 32], strides = [1, 1]} : vector<2x128xf32> to vector<2x32xf32>
    %75 = vector.extract_strided_slice %72 {offsets = [0, 64], sizes = [2, 32], strides = [1, 1]} : vector<2x128xf32> to vector<2x32xf32>
    %76 = vector.extract_strided_slice %72 {offsets = [0, 96], sizes = [2, 32], strides = [1, 1]} : vector<2x128xf32> to vector<2x32xf32>
    %77 = arith.mulf %74, %58 : vector<2x32xf32>
    %78 = arith.mulf %73, %75 : vector<2x32xf32>
    %79 = arith.addf %77, %78 : vector<2x32xf32>
    %80 = math.tanh %79 : vector<2x32xf32>
    %81 = arith.mulf %76, %80 : vector<2x32xf32>
    %c0_34 = arith.constant 0 : index
    %c2_35 = arith.constant 2 : index
    %c0_36 = arith.constant 0 : index
    %82 = vector.load %arg9[%c0_34, %c2_35, %c0_36] : memref<2x8x32xf32, #tpu.memory_space<vmem>>, vector<2x1x32xf32>
    %83 = vector.shape_cast %82 : vector<2x1x32xf32> to vector<2x32xf32>
    %84 = vector.shape_cast %81 : vector<2x32xf32> to vector<2x1x32xf32>
    tpu.vector_store %arg9[%c0_34, %c2_35, %c0_36], %84 {strides = array<i32>} : memref<2x8x32xf32, #tpu.memory_space<vmem>>, vector<2x1x32xf32>,
    %c0_37 = arith.constant 0 : index
    %c3 = arith.constant 3 : index
    %c0_38 = arith.constant 0 : index
    %85 = vector.load %arg11[%c0_37, %c3, %c0_38] : memref<2x8x128xf32, #tpu.memory_space<vmem>>, vector<2x1x128xf32>
    %86 = vector.shape_cast %85 : vector<2x1x128xf32> to vector<2x128xf32>
    %cst_39 = arith.constant dense<0.000000e+00> : vector<2x128xf32>
    %87 = tpu.matmul %81, %7, %cst_39 {dimension_numbers = #tpu.dot_dimension_numbers<[1], [0], [0], [1], [0, 0, 1, 1], [], []>} : vector<2x32xf32>, vector<32x128xf32>, vector<2x128xf32> -> vector<2x128xf32>
    %88 = arith.addf %86, %87 : vector<2x128xf32>
    %89 = math.tanh %88 : vector<2x128xf32>
    %90 = vector.broadcast %16 : vector<1x128xf32> to vector<2x128xf32>
    %91 = arith.mulf %89, %90 : vector<2x128xf32>
    %92 = vector.broadcast %19 : vector<1x128xf32> to vector<2x128xf32>
    %93 = arith.addf %91, %92 : vector<2x128xf32>
    %94 = vector.extract_strided_slice %93 {offsets = [0, 0], sizes = [2, 32], strides = [1, 1]} : vector<2x128xf32> to vector<2x32xf32>
    %95 = vector.extract_strided_slice %93 {offsets = [0, 32], sizes = [2, 32], strides = [1, 1]} : vector<2x128xf32> to vector<2x32xf32>
    %96 = vector.extract_strided_slice %93 {offsets = [0, 64], sizes = [2, 32], strides = [1, 1]} : vector<2x128xf32> to vector<2x32xf32>
    %97 = vector.extract_strided_slice %93 {offsets = [0, 96], sizes = [2, 32], strides = [1, 1]} : vector<2x128xf32> to vector<2x32xf32>
    %98 = arith.mulf %95, %79 : vector<2x32xf32>
    %99 = arith.mulf %94, %96 : vector<2x32xf32>
    %100 = arith.addf %98, %99 : vector<2x32xf32>
    %101 = math.tanh %100 : vector<2x32xf32>
    %102 = arith.mulf %97, %101 : vector<2x32xf32>
    %c0_40 = arith.constant 0 : index
    %c3_41 = arith.constant 3 : index
    %c0_42 = arith.constant 0 : index
    %103 = vector.load %arg9[%c0_40, %c3_41, %c0_42] : memref<2x8x32xf32, #tpu.memory_space<vmem>>, vector<2x1x32xf32>
    %104 = vector.shape_cast %103 : vector<2x1x32xf32> to vector<2x32xf32>
    %105 = vector.shape_cast %102 : vector<2x32xf32> to vector<2x1x32xf32>
    tpu.vector_store %arg9[%c0_40, %c3_41, %c0_42], %105 {strides = array<i32>} : memref<2x8x32xf32, #tpu.memory_space<vmem>>, vector<2x1x32xf32>,
    %c0_43 = arith.constant 0 : index
    %c4 = arith.constant 4 : index
    %c0_44 = arith.constant 0 : index
    %106 = vector.load %arg11[%c0_43, %c4, %c0_44] : memref<2x8x128xf32, #tpu.memory_space<vmem>>, vector<2x1x128xf32>
    %107 = vector.shape_cast %106 : vector<2x1x128xf32> to vector<2x128xf32>
    %cst_45 = arith.constant dense<0.000000e+00> : vector<2x128xf32>
    %108 = tpu.matmul %102, %7, %cst_45 {dimension_numbers = #tpu.dot_dimension_numbers<[1], [0], [0], [1], [0, 0, 1, 1], [], []>} : vector<2x32xf32>, vector<32x128xf32>, vector<2x128xf32> -> vector<2x128xf32>
    %109 = arith.addf %107, %108 : vector<2x128xf32>
    %110 = math.tanh %109 : vector<2x128xf32>
    %111 = vector.broadcast %16 : vector<1x128xf32> to vector<2x128xf32>
    %112 = arith.mulf %110, %111 : vector<2x128xf32>
    %113 = vector.broadcast %19 : vector<1x128xf32> to vector<2x128xf32>
    %114 = arith.addf %112, %113 : vector<2x128xf32>
    %115 = vector.extract_strided_slice %114 {offsets = [0, 0], sizes = [2, 32], strides = [1, 1]} : vector<2x128xf32> to vector<2x32xf32>
    %116 = vector.extract_strided_slice %114 {offsets = [0, 32], sizes = [2, 32], strides = [1, 1]} : vector<2x128xf32> to vector<2x32xf32>
    %117 = vector.extract_strided_slice %114 {offsets = [0, 64], sizes = [2, 32], strides = [1, 1]} : vector<2x128xf32> to vector<2x32xf32>
    %118 = vector.extract_strided_slice %114 {offsets = [0, 96], sizes = [2, 32], strides = [1, 1]} : vector<2x128xf32> to vector<2x32xf32>
    %119 = arith.mulf %116, %100 : vector<2x32xf32>
    %120 = arith.mulf %115, %117 : vector<2x32xf32>
    %121 = arith.addf %119, %120 : vector<2x32xf32>
    %122 = math.tanh %121 : vector<2x32xf32>
    %123 = arith.mulf %118, %122 : vector<2x32xf32>
    %c0_46 = arith.constant 0 : index
    %c4_47 = arith.constant 4 : index
    %c0_48 = arith.constant 0 : index
    %124 = vector.load %arg9[%c0_46, %c4_47, %c0_48] : memref<2x8x32xf32, #tpu.memory_space<vmem>>, vector<2x1x32xf32>
    %125 = vector.shape_cast %124 : vector<2x1x32xf32> to vector<2x32xf32>
    %126 = vector.shape_cast %123 : vector<2x32xf32> to vector<2x1x32xf32>
    tpu.vector_store %arg9[%c0_46, %c4_47, %c0_48], %126 {strides = array<i32>} : memref<2x8x32xf32, #tpu.memory_space<vmem>>, vector<2x1x32xf32>,
    %c0_49 = arith.constant 0 : index
    %c5 = arith.constant 5 : index
    %c0_50 = arith.constant 0 : index
    %127 = vector.load %arg11[%c0_49, %c5, %c0_50] : memref<2x8x128xf32, #tpu.memory_space<vmem>>, vector<2x1x128xf32>
    %128 = vector.shape_cast %127 : vector<2x1x128xf32> to vector<2x128xf32>
    %cst_51 = arith.constant dense<0.000000e+00> : vector<2x128xf32>
    %129 = tpu.matmul %123, %7, %cst_51 {dimension_numbers = #tpu.dot_dimension_numbers<[1], [0], [0], [1], [0, 0, 1, 1], [], []>} : vector<2x32xf32>, vector<32x128xf32>, vector<2x128xf32> -> vector<2x128xf32>
    %130 = arith.addf %128, %129 : vector<2x128xf32>
    %131 = math.tanh %130 : vector<2x128xf32>
    %132 = vector.broadcast %16 : vector<1x128xf32> to vector<2x128xf32>
    %133 = arith.mulf %131, %132 : vector<2x128xf32>
    %134 = vector.broadcast %19 : vector<1x128xf32> to vector<2x128xf32>
    %135 = arith.addf %133, %134 : vector<2x128xf32>
    %136 = vector.extract_strided_slice %135 {offsets = [0, 0], sizes = [2, 32], strides = [1, 1]} : vector<2x128xf32> to vector<2x32xf32>
    %137 = vector.extract_strided_slice %135 {offsets = [0, 32], sizes = [2, 32], strides = [1, 1]} : vector<2x128xf32> to vector<2x32xf32>
    %138 = vector.extract_strided_slice %135 {offsets = [0, 64], sizes = [2, 32], strides = [1, 1]} : vector<2x128xf32> to vector<2x32xf32>
    %139 = vector.extract_strided_slice %135 {offsets = [0, 96], sizes = [2, 32], strides = [1, 1]} : vector<2x128xf32> to vector<2x32xf32>
    %140 = arith.mulf %137, %121 : vector<2x32xf32>
    %141 = arith.mulf %136, %138 : vector<2x32xf32>
    %142 = arith.addf %140, %141 : vector<2x32xf32>
    %143 = math.tanh %142 : vector<2x32xf32>
    %144 = arith.mulf %139, %143 : vector<2x32xf32>
    %c0_52 = arith.constant 0 : index
    %c5_53 = arith.constant 5 : index
    %c0_54 = arith.constant 0 : index
    %145 = vector.load %arg9[%c0_52, %c5_53, %c0_54] : memref<2x8x32xf32, #tpu.memory_space<vmem>>, vector<2x1x32xf32>
    %146 = vector.shape_cast %145 : vector<2x1x32xf32> to vector<2x32xf32>
    %147 = vector.shape_cast %144 : vector<2x32xf32> to vector<2x1x32xf32>
    tpu.vector_store %arg9[%c0_52, %c5_53, %c0_54], %147 {strides = array<i32>} : memref<2x8x32xf32, #tpu.memory_space<vmem>>, vector<2x1x32xf32>,
    %c0_55 = arith.constant 0 : index
    %c6 = arith.constant 6 : index
    %c0_56 = arith.constant 0 : index
    %148 = vector.load %arg11[%c0_55, %c6, %c0_56] : memref<2x8x128xf32, #tpu.memory_space<vmem>>, vector<2x1x128xf32>
    %149 = vector.shape_cast %148 : vector<2x1x128xf32> to vector<2x128xf32>
    %cst_57 = arith.constant dense<0.000000e+00> : vector<2x128xf32>
    %150 = tpu.matmul %144, %7, %cst_57 {dimension_numbers = #tpu.dot_dimension_numbers<[1], [0], [0], [1], [0, 0, 1, 1], [], []>} : vector<2x32xf32>, vector<32x128xf32>, vector<2x128xf32> -> vector<2x128xf32>
    %151 = arith.addf %149, %150 : vector<2x128xf32>
    %152 = math.tanh %151 : vector<2x128xf32>
    %153 = vector.broadcast %16 : vector<1x128xf32> to vector<2x128xf32>
    %154 = arith.mulf %152, %153 : vector<2x128xf32>
    %155 = vector.broadcast %19 : vector<1x128xf32> to vector<2x128xf32>
    %156 = arith.addf %154, %155 : vector<2x128xf32>
    %157 = vector.extract_strided_slice %156 {offsets = [0, 0], sizes = [2, 32], strides = [1, 1]} : vector<2x128xf32> to vector<2x32xf32>
    %158 = vector.extract_strided_slice %156 {offsets = [0, 32], sizes = [2, 32], strides = [1, 1]} : vector<2x128xf32> to vector<2x32xf32>
    %159 = vector.extract_strided_slice %156 {offsets = [0, 64], sizes = [2, 32], strides = [1, 1]} : vector<2x128xf32> to vector<2x32xf32>
    %160 = vector.extract_strided_slice %156 {offsets = [0, 96], sizes = [2, 32], strides = [1, 1]} : vector<2x128xf32> to vector<2x32xf32>
    %161 = arith.mulf %158, %142 : vector<2x32xf32>
    %162 = arith.mulf %157, %159 : vector<2x32xf32>
    %163 = arith.addf %161, %162 : vector<2x32xf32>
    %164 = math.tanh %163 : vector<2x32xf32>
    %165 = arith.mulf %160, %164 : vector<2x32xf32>
    %c0_58 = arith.constant 0 : index
    %c6_59 = arith.constant 6 : index
    %c0_60 = arith.constant 0 : index
    %166 = vector.load %arg9[%c0_58, %c6_59, %c0_60] : memref<2x8x32xf32, #tpu.memory_space<vmem>>, vector<2x1x32xf32>
    %167 = vector.shape_cast %166 : vector<2x1x32xf32> to vector<2x32xf32>
    %168 = vector.shape_cast %165 : vector<2x32xf32> to vector<2x1x32xf32>
    tpu.vector_store %arg9[%c0_58, %c6_59, %c0_60], %168 {strides = array<i32>} : memref<2x8x32xf32, #tpu.memory_space<vmem>>, vector<2x1x32xf32>,
    %c0_61 = arith.constant 0 : index
    %c7 = arith.constant 7 : index
    %c0_62 = arith.constant 0 : index
    %169 = vector.load %arg11[%c0_61, %c7, %c0_62] : memref<2x8x128xf32, #tpu.memory_space<vmem>>, vector<2x1x128xf32>
    %170 = vector.shape_cast %169 : vector<2x1x128xf32> to vector<2x128xf32>
    %cst_63 = arith.constant dense<0.000000e+00> : vector<2x128xf32>
    %171 = tpu.matmul %165, %7, %cst_63 {dimension_numbers = #tpu.dot_dimension_numbers<[1], [0], [0], [1], [0, 0, 1, 1], [], []>} : vector<2x32xf32>, vector<32x128xf32>, vector<2x128xf32> -> vector<2x128xf32>
    %172 = arith.addf %170, %171 : vector<2x128xf32>
    %173 = math.tanh %172 : vector<2x128xf32>
    %174 = vector.broadcast %16 : vector<1x128xf32> to vector<2x128xf32>
    %175 = arith.mulf %173, %174 : vector<2x128xf32>
    %176 = vector.broadcast %19 : vector<1x128xf32> to vector<2x128xf32>
    %177 = arith.addf %175, %176 : vector<2x128xf32>
    %178 = vector.extract_strided_slice %177 {offsets = [0, 0], sizes = [2, 32], strides = [1, 1]} : vector<2x128xf32> to vector<2x32xf32>
    %179 = vector.extract_strided_slice %177 {offsets = [0, 32], sizes = [2, 32], strides = [1, 1]} : vector<2x128xf32> to vector<2x32xf32>
    %180 = vector.extract_strided_slice %177 {offsets = [0, 64], sizes = [2, 32], strides = [1, 1]} : vector<2x128xf32> to vector<2x32xf32>
    %181 = vector.extract_strided_slice %177 {offsets = [0, 96], sizes = [2, 32], strides = [1, 1]} : vector<2x128xf32> to vector<2x32xf32>
    %182 = arith.mulf %179, %163 : vector<2x32xf32>
    %183 = arith.mulf %178, %180 : vector<2x32xf32>
    %184 = arith.addf %182, %183 : vector<2x32xf32>
    %185 = math.tanh %184 : vector<2x32xf32>
    %186 = arith.mulf %181, %185 : vector<2x32xf32>
    %c0_64 = arith.constant 0 : index
    %c7_65 = arith.constant 7 : index
    %c0_66 = arith.constant 0 : index
    %187 = vector.load %arg9[%c0_64, %c7_65, %c0_66] : memref<2x8x32xf32, #tpu.memory_space<vmem>>, vector<2x1x32xf32>
    %188 = vector.shape_cast %187 : vector<2x1x32xf32> to vector<2x32xf32>
    %189 = vector.shape_cast %186 : vector<2x32xf32> to vector<2x1x32xf32>
    tpu.vector_store %arg9[%c0_64, %c7_65, %c0_66], %189 {strides = array<i32>} : memref<2x8x32xf32, #tpu.memory_space<vmem>>, vector<2x1x32xf32>,
    %c0_67 = arith.constant 0 : index
    %c0_68 = arith.constant 0 : index
    %190 = vector.load %arg5[%c0_67, %c0_68] : memref<32x16xf32, #tpu.memory_space<vmem>>, vector<32x16xf32>
    %cst_69 = arith.constant dense<0.000000e+00> : vector<2x16xf32>
    %191 = tpu.matmul %186, %190, %cst_69 {dimension_numbers = #tpu.dot_dimension_numbers<[1], [0], [0], [1], [0, 0, 1, 1], [], []>} : vector<2x32xf32>, vector<32x16xf32>, vector<2x16xf32> -> vector<2x16xf32>
    %c0_70 = arith.constant 0 : index
    %c0_71 = arith.constant 0 : index
    %192 = vector.load %arg6[%c0_70, %c0_71] : memref<1x16xf32, #tpu.memory_space<vmem>>, vector<1x16xf32>
    %193 = vector.broadcast %192 : vector<1x16xf32> to vector<2x16xf32>
    %194 = arith.addf %191, %193 : vector<2x16xf32>
    %cst_72 = arith.constant 0.000000e+00 : f32
    %195 = vector.broadcast %cst_72 : f32 to vector<2x16xf32>
    %196 = arith.maximumf %194, %195 : vector<2x16xf32>
    %c0_73 = arith.constant 0 : index
    %c0_74 = arith.constant 0 : index
    %197 = vector.load %arg7[%c0_73, %c0_74] : memref<16x8xf32, #tpu.memory_space<vmem>>, vector<16x8xf32>
    %cst_75 = arith.constant dense<0.000000e+00> : vector<2x8xf32>
    %198 = tpu.matmul %196, %197, %cst_75 {dimension_numbers = #tpu.dot_dimension_numbers<[1], [0], [0], [1], [0, 0, 1, 1], [], []>} : vector<2x16xf32>, vector<16x8xf32>, vector<2x8xf32> -> vector<2x8xf32>
    %c0_76 = arith.constant 0 : index
    %c0_77 = arith.constant 0 : index
    %199 = vector.load %arg8[%c0_76, %c0_77] : memref<1x8xf32, #tpu.memory_space<vmem>>, vector<1x8xf32>
    %200 = vector.broadcast %199 : vector<1x8xf32> to vector<2x8xf32>
    %201 = arith.addf %198, %200 : vector<2x8xf32>
    %202 = arith.mulf %201, %201 : vector<2x8xf32>
    %cst_78 = arith.constant dense<0.000000e+00> : vector<2xf32>
    %203 = vector.multi_reduction <add>, %202, %cst_78 [1] : vector<2x8xf32> to vector<2xf32>
    %204 = vector.shape_cast %203 : vector<2xf32> to vector<2x1xf32>
    %cst_79 = arith.constant 1.000000e-24 : f32
    %205 = vector.broadcast %cst_79 : f32 to vector<2x1xf32>
    %206 = arith.maximumf %204, %205 : vector<2x1xf32>
    %207 = math.rsqrt %206 : vector<2x1xf32>
    %208 = vector.broadcast %207 : vector<2x1xf32> to vector<2x8xf32>
    %209 = arith.mulf %201, %208 : vector<2x8xf32>
    %c0_80 = arith.constant 0 : index
    %c0_81 = arith.constant 0 : index
    %210 = vector.load %arg10[%c0_80, %c0_81] : memref<2x8xf32, #tpu.memory_space<vmem>>, vector<2x8xf32>
    tpu.vector_store %arg10[%c0_80, %c0_81], %209 {strides = array<i32>} : memref<2x8xf32, #tpu.memory_space<vmem>>, vector<2x8xf32>,
    return
  }
  func.func @transform_0(%arg0: i32) -> (i32, i32, i32) {
    %c0_i32 = arith.constant 0 : i32
    %c0_i32_0 = arith.constant 0 : i32
    %c0_i32_1 = arith.constant 0 : i32
    return %arg0, %c0_i32, %c0_i32_0 : i32, i32, i32
  }
  func.func @transform_1(%arg0: i32) -> (i32, i32) {
    %c0_i32 = arith.constant 0 : i32
    %c0_i32_0 = arith.constant 0 : i32
    %c0_i32_1 = arith.constant 0 : i32
    return %c0_i32, %c0_i32_0 : i32, i32
  }
  func.func @transform_2(%arg0: i32) -> (i32, i32) {
    %c0_i32 = arith.constant 0 : i32
    %c0_i32_0 = arith.constant 0 : i32
    %c0_i32_1 = arith.constant 0 : i32
    return %c0_i32, %c0_i32_0 : i32, i32
  }
  func.func @transform_3(%arg0: i32) -> (i32, i32, i32) {
    %c0_i32 = arith.constant 0 : i32
    %c0_i32_0 = arith.constant 0 : i32
    %c0_i32_1 = arith.constant 0 : i32
    %c0_i32_2 = arith.constant 0 : i32
    return %c0_i32, %c0_i32_0, %c0_i32_1 : i32, i32, i32
  }
  func.func @transform_4(%arg0: i32) -> (i32, i32) {
    %c0_i32 = arith.constant 0 : i32
    %c0_i32_0 = arith.constant 0 : i32
    %c0_i32_1 = arith.constant 0 : i32
    return %c0_i32, %c0_i32_0 : i32, i32
  }
  func.func @transform_5(%arg0: i32) -> (i32, i32) {
    %c0_i32 = arith.constant 0 : i32
    %c0_i32_0 = arith.constant 0 : i32
    %c0_i32_1 = arith.constant 0 : i32
    return %c0_i32, %c0_i32_0 : i32, i32
  }
  func.func @transform_6(%arg0: i32) -> (i32, i32) {
    %c0_i32 = arith.constant 0 : i32
    %c0_i32_0 = arith.constant 0 : i32
    %c0_i32_1 = arith.constant 0 : i32
    return %c0_i32, %c0_i32_0 : i32, i32
  }
  func.func @transform_7(%arg0: i32) -> (i32, i32) {
    %c0_i32 = arith.constant 0 : i32
    %c0_i32_0 = arith.constant 0 : i32
    %c0_i32_1 = arith.constant 0 : i32
    return %c0_i32, %c0_i32_0 : i32, i32
  }
  func.func @transform_8(%arg0: i32) -> (i32, i32, i32) {
    %c0_i32 = arith.constant 0 : i32
    %c0_i32_0 = arith.constant 0 : i32
    %c0_i32_1 = arith.constant 0 : i32
    return %arg0, %c0_i32, %c0_i32_0 : i32, i32, i32
  }
  func.func @transform_9(%arg0: i32) -> (i32, i32) {
    %c0_i32 = arith.constant 0 : i32
    %c0_i32_0 = arith.constant 0 : i32
    return %arg0, %c0_i32 : i32, i32
  }
}

</mosaic_0001>

<bundles_post_ra>
// kernel: tpu_custom_call.1
= control target key start
LH: loop header
LB: loop body
LE: loop exit
PB: predicated region body
PF: predicated region fallthrough
CT: control target
= control target key end

     0   :  { %15 = vsyncpa [#allocation4], 0  ;;  %vm50_vm0 = vcmask 1043456   ;;  %vm43_vm1 = vcmask 31744   ;;  %v1782_v5 = vmov 0.0|0.0   ;;  %s2176_s0 = inlined_call_operand.vmem [shape: f32[2,8,4], index: 0, kind: input, shape index: {}]   ;;  %s2177_s1 = inlined_call_operand.vmem [shape: f32[4,128], index: 1, kind: input, shape index: {}]   ;;  %s2178_s2 = inlined_call_operand.vmem [shape: f32[32,128], index: 2, kind: input, shape index: {}]   ;;  %s2179_s3 = inlined_call_operand.vmem [shape: f32[1,1,128], index: 3, kind: input, shape index: {}]   ;;  %s2180_s4 = inlined_call_operand.vmem [shape: f32[32,16], index: 4, kind: input, shape index: {}]   ;;  %s2181_s5 = inlined_call_operand.vmem [shape: f32[1,16], index: 5, kind: input, shape index: {}]   ;;  %s2182_s6 = inlined_call_operand.vmem [shape: f32[16,8], index: 6, kind: input, shape index: {}]   ;;  %s2183_s7 = inlined_call_operand.vmem [shape: f32[1,8], index: 7, kind: input, shape index: {}]   ;;  %s2184_s8 = inlined_call_operand.hbm [shape: f32[2,8,32], index: 8, kind: output, shape index: {0}]   ;;  %s2185_s9 = inlined_call_operand.hbm [shape: f32[2,8], index: 9, kind: output, shape index: {1}]  }
   0x1   :  { %v35_v0 = vld [vmem:[%s2177_s1] sm:$0xf]  ;;  %v34_v2 = vld [vmem:[%s2176_s0 + $0x8] sm:$0xff]  ;;  %1601 = vmatprep.subr.bf16.mxu1 %v1782_v5  ;;  %v133_v7 = vld [vmem:[%s2178_s2 + $0x10] sm:$0xff] }
   0x2   :  { %v33_v1 = vld [vmem:[%s2176_s0] sm:$0xff]  ;;  %1490 = vmatprep.subr.msk.mxu0 %vm50_vm0, %v35_v0  ;;  %v132_v4 = vld [vmem:[%s2178_s2 + $0x8] sm:$0xff]  ;;  %v134_v8 = vld [vmem:[%s2178_s2 + $0x18] sm:$0xff] }
   0x3   :  { %1492 = vmatprep.mubr.msk.f32.mxu0 %vm43_vm1, %v33_v1  ;;  %v131_v3 = vld [vmem:[%s2178_s2] sm:$0xff]  ;;  %1491 = vmatpush3.msk.msra.mxu0 %vm50_vm0, %v35_v0 }
   0x4   :  { %v1858_v6 = vpack.c.bf16 %v132_v4, %v131_v3 }
   0x5   :  { %16 = vsyncpa [#allocation6], 0  ;;  %1493 = vmatmul.mubr.msk.f32.vlgmr.msra.gmra.mrb[0].mxu0 %vm43_vm1, %v34_v2  ;;  %vm1783_vm2 = vmmov 0   ;;  %v1784_v9 = vmov 0.0   ;;  %v1869_v10 = vpack.c.bf16 %v134_v8, %v133_v7  ;;  %1607 = vmatprep.subr.bf16.mxu0 %v1782_v5  ;;  %v1424_v11 = vld [vmem:[%s2179_s3] ss:$0 sm:$0xff]  ;;  %v135_v16 = vlaneseq }
   0x6   :  { %1503 = vmatprep.mubr.msk.f32.mxu1 %vm1783_vm2, %v1784_v9  ;;  %1603 = vmatpush3.bf16.msra.mxu1 %v1858_v6  ;;  %v1785_v25 = vmov 0.5   ;;  %s1786_s3 = smov 64   ;;  %s1787_s22 = smov 32   ;;  %vm278_vm6 = vcmask 1041409   ;;  %vm144_vm7 = vcmask 261120   ;;  %vm272_vm8 = vcmask 253952  }
   0x7   :  { %1604 = vmatprep.subr.bf16.mxu1 %v1782_v5  ;;  %1609 = vmatpush3.bf16.msra.mxu0 %v1858_v6  ;;  %v136_v23 = vand.u32 127, %v135_v16  ;;  %vm1311_vm9 = vcmask 130048   ;;  %vm1386_vm10 = vcmask 58368  }
   0x8   :  { %1610 = vmatprep.subr.bf16.mxu0 %v1782_v5  ;;  %1514 = vmatprep.mubr.msk.f32.mxu0 %vm1783_vm2, %v1784_v9 }
   0x9   :  { %vm137_vm3 = vcmp.ge.s32.totalorder %v136_v23, 64  ;;  %vm138_vm4 = vcmp.lt.s32.totalorder %v136_v23, 96 }
   0xa   :  { %1606 = vmatpush3.bf16.msra.mxu1 %v1869_v10  ;;  %vm139_vm5 = vmand %vm137_vm3, %vm138_vm4 }
   0xb   :  { %1612 = vmatpush3.bf16.msra.mxu0 %v1869_v10  ;;  %1613 = vmatprep.subr.bf16.mxu1 %v1782_v5  ;;  %v1891_v26 = vsel %vm139_vm5, 1.0, %v1785_v25  ;;  %v1893_v28 = vsel %vm139_vm5, 0.0, %v1785_v25 }
   0xc   :  { %1619 = vmatprep.subr.bf16.mxu0 %v1782_v5 }
   0xd   :  { %1504 = vmatmul.mubr.f32.vlgmr.msra.gmra.mrb[0].mxu1 %v1784_v9 }
   0xe   :  { %1615 = vmatpush3.bf16.msra.mxu1 %v1858_v6  ;;  %1525 = vmatprep.mubr.msk.f32.mxu1 %vm1783_vm2, %v1784_v9 }
   0xf   :  { %1616 = vmatprep.subr.bf16.mxu1 %v1782_v5 }
  0x12   :  { %1618 = vmatpush3.bf16.msra.mxu1 %v1869_v10 }
  0x13   :  { %1625 = vmatprep.subr.bf16.mxu1 %v1782_v5 }
  0xd8   :  { %v1494_v12 = vpop.f32.mrb[0].mxu0 }
  0xd9   :  { %v126_v13 = vadd.f32 %v1494_v12, %v1424_v11  ;;  %v120_v14 = vpop.f32.mrb[1].mxu0 }
  0xda   :  { %v121_v15 = vadd.f32 %v1424_v11, %v120_v14 }
  0xdb   :  { %130 = vst [vmem:[#allocation2 + $0x8] sm:$0xff] %v126_v13 }
  0xdc   :  { %129 = vst [vmem:[#allocation2] sm:$0xff] %v121_v15 }
  0xe0   :  { %v214_v17 = vpop.f32.mrb[0].mxu1 }
  0xe1   :  { %v219_v18 = vrot.slane %v214_v17, 1  ;;  %v1505_v19 = vpop.f32.mrb[1].mxu1 }
  0xe2   :  { %v143_v20 = vld [vmem:[#allocation2 + $0x8] sm:$0x1]  ;;  %v276_v58 = vld [vmem:[#allocation2 + $0x9] sm:$0x1] }
  0xe3   :  { %v142_v21 = vld [vmem:[#allocation2] sm:$0x1]  ;;  %v223_v22 = vadd.f32 %v219_v18, %v143_v20  ;;  %v275_v53 = vld [vmem:[#allocation2 + $0x1] sm:$0x1]  ;;  %v410_v25 = vld [vmem:[#allocation2 + $0x2] sm:$0x1] }
  0xe4   :  { %v222_v24 = vadd.f32 %v214_v17, %v142_v21 }
  0xe5   :  { %1668 = vtanh.f32 %v223_v22 }
  0xe6   :  { %1670 = vtanh.f32 %v222_v24 }
  0xef   :  { %v1669_v27 = vpop.eup %1668 }
  0xf0   :  { %v1671_v29 = vpop.eup %1670  ;;  %v227_v30 = vmul.f32 %v1669_v27, %v1891_v26 }
  0xf1   :  { %v226_v32 = vmul.f32 %v1671_v29, %v1891_v26 }
  0xf2   :  { %v229_v31 = vadd.f32 %v227_v30, %v1893_v28 }
  0xf3   :  { %v228_v33 = vadd.f32 %v226_v32, %v1893_v28  ;;  %v411_v32 = vld [vmem:[#allocation2 + $0xa] sm:$0x1] }
  0xf4   :  { %236 = vrot.lane.b32.xlu0 %v229_v31, %s1786_s3  ;;  %v231_v38 = vmul.f32 0.0, %v229_v31 }
  0xf5   :  { %v230_v41 = vmul.f32 0.0, %v228_v33 }
  0xf8   :  { %234 = vrot.lane.b32.xlu0 %v228_v33, %s1786_s3 }
 0x166   :  { %v237_v34 = vpop.permute.xlu0 %236 }
 0x167   :  { %v241_v35 = vmul.f32 %v237_v34, %v229_v31 }
 0x169   :  { %246 = vrot.lane.b32.xlu1 %v241_v35, %s1787_s22 }
 0x16a   :  { %v235_v36 = vpop.permute.xlu0 %234 }
 0x16b   :  { %v240_v37 = vmul.f32 %v235_v36, %v228_v33 }
 0x16d   :  { %244 = vrot.lane.b32.xlu1 %v240_v37, %s1787_s22 }
 0x1db   :  { %v247_v39 = vpop.permute.xlu1 %246 }
 0x1dc   :  { %v251_v40 = vadd.f32 %v247_v39, %v231_v38 }
 0x1de   :  { %1672 = vtanh.f32 %v251_v40 }
 0x1df   :  { %v245_v42 = vpop.permute.xlu1 %244 }
 0x1e0   :  { %v250_v43 = vadd.f32 %v245_v42, %v230_v41 }
 0x1e2   :  { %1674 = vtanh.f32 %v250_v43 }
 0x1e8   :  { %v1673_v44 = vpop.eup %1672 }
 0x1e9   :  { %258 = vrot.lane.b32.xlu0 %v1673_v44, %s1786_s3 }
 0x1ec   :  { %v1675_v45 = vpop.eup %1674 }
 0x1ed   :  { %256 = vrot.lane.b32.xlu1 %v1675_v45, %s1786_s3 }
 0x25b   :  { %v259_v46 = vpop.permute.xlu0 %258 }
 0x25c   :  { %v1905_v47 = vmul.f32 %v259_v46, %v229_v31 }
 0x25e   :  { %v277_v49 = vrot.slane %v1905_v47, 7 }
 0x25f   :  { %v257_v48 = vpop.permute.xlu1 %256 }
 0x260   :  { %v1908_v50 = vmul.f32 %v257_v48, %v228_v33 }
 0x262   :  { %v279_v51 = vsel %vm278_vm6, %v277_v49, %v1908_v50 }
 0x263   :  { %280 = vrot.lane.b32.xlu0 %v279_v51, %s1787_s22 }
 0x2d5   :  { %v281_v52 = vpop.permute.xlu0 %280 }
 0x2d6   :  { %1515 = vmatmul.mubr.msk.f32.vlgmr.msra.gmra.mrb[2].mxu0 %vm144_vm7, %v281_v52 }
 0x2d7   :  { %1621 = vmatpush3.bf16.msra.mxu0 %v1858_v6  ;;  %1536 = vmatprep.mubr.msk.f32.mxu0 %vm1783_vm2, %v1784_v9 }
 0x2d8   :  { %1622 = vmatprep.subr.bf16.mxu0 %v1782_v5 }
 0x2db   :  { %1624 = vmatpush3.bf16.msra.mxu0 %v1869_v10 }
 0x2dc   :  { %1631 = vmatprep.subr.bf16.mxu0 %v1782_v5 }
 0x3a9   :  { %v350_v54 = vpop.f32.mrb[2].mxu0 }
 0x3aa   :  { %v355_v55 = vrot.slane %v350_v54, 1  ;;  %v358_v56 = vadd.f32 %v350_v54, %v275_v53  ;;  %v1516_v57 = vpop.f32.mrb[3].mxu0 }
 0x3ac   :  { %v359_v59 = vadd.f32 %v355_v55, %v276_v58  ;;  %1676 = vtanh.f32 %v358_v56 }
 0x3ae   :  { %1678 = vtanh.f32 %v359_v59 }
 0x3b6   :  { %v1677_v60 = vpop.eup %1676 }
 0x3b7   :  { %v362_v61 = vmul.f32 %v1677_v60, %v1891_v26 }
 0x3b8   :  { %v1679_v62 = vpop.eup %1678 }
 0x3b9   :  { %v364_v63 = vadd.f32 %v362_v61, %v1893_v28  ;;  %v363_v0 = vmul.f32 %v1679_v62, %v1891_v26  ;;  %v544_v61 = vld [vmem:[#allocation2 + $0x3] sm:$0x1] }
 0x3bb   :  { %370 = vrot.lane.b32.xlu0 %v364_v63, %s1786_s3  ;;  %v365_v1 = vadd.f32 %v363_v0, %v1893_v28  ;;  %v366_v8 = vmul.f32 %v364_v63, %v250_v43 }
 0x3bd   :  { %372 = vrot.lane.b32.xlu1 %v365_v1, %s1786_s3  ;;  %v367_v13 = vmul.f32 %v365_v1, %v251_v40 }
 0x42d   :  { %v371_v2 = vpop.permute.xlu0 %370 }
 0x42e   :  { %v376_v3 = vmul.f32 %v371_v2, %v364_v63  ;;  %v545_v2 = vld [vmem:[#allocation2 + $0xb] sm:$0x1] }
 0x42f   :  { %v373_v4 = vpop.permute.xlu1 %372 }
 0x430   :  { %v377_v7 = vmul.f32 %v373_v4, %v365_v1  ;;  %380 = vrot.lane.b32.xlu0 %v376_v3, %s1787_s22 }
 0x432   :  { %382 = vrot.lane.b32.xlu1 %v377_v7, %s1787_s22 }
 0x4a2   :  { %v381_v11 = vpop.permute.xlu0 %380 }
 0x4a3   :  { %v386_v12 = vadd.f32 %v381_v11, %v366_v8 }
 0x4a4   :  { %v383_v14 = vpop.permute.xlu1 %382 }
 0x4a5   :  { %1680 = vtanh.f32 %v386_v12  ;;  %v387_v15 = vadd.f32 %v383_v14, %v367_v13 }
 0x4a7   :  { %1682 = vtanh.f32 %v387_v15 }
 0x4af   :  { %v1681_v16 = vpop.eup %1680 }
 0x4b0   :  { %392 = vrot.lane.b32.xlu0 %v1681_v16, %s1786_s3 }
 0x4b1   :  { %v1683_v17 = vpop.eup %1682 }
 0x4b2   :  { %394 = vrot.lane.b32.xlu1 %v1683_v17, %s1786_s3 }
 0x522   :  { %v393_v18 = vpop.permute.xlu0 %392 }
 0x523   :  { %v1932_v21 = vmul.f32 %v393_v18, %v364_v63 }
 0x524   :  { %v395_v19 = vpop.permute.xlu1 %394 }
 0x525   :  { %v1930_v20 = vmul.f32 %v395_v19, %v365_v1 }
 0x527   :  { %v412_v22 = vrot.slane %v1930_v20, 7 }
 0x529   :  { %v413_v23 = vsel %vm278_vm6, %v412_v22, %v1932_v21 }
 0x52a   :  { %414 = vrot.lane.b32.xlu1 %v413_v23, %s1787_s22 }
 0x59c   :  { %v415_v24 = vpop.permute.xlu1 %414 }
 0x59d   :  { %1526 = vmatmul.mubr.msk.f32.vlgmr.msra.gmra.mrb[2].mxu1 %vm144_vm7, %v415_v24 }
 0x59e   :  { %1627 = vmatpush3.bf16.msra.mxu1 %v1858_v6  ;;  %1547 = vmatprep.mubr.msk.f32.mxu1 %vm1783_vm2, %v1784_v9 }
 0x59f   :  { %1628 = vmatprep.subr.bf16.mxu1 %v1782_v5 }
 0x5a2   :  { %1630 = vmatpush3.bf16.msra.mxu1 %v1869_v10 }
 0x5a3   :  { %1637 = vmatprep.subr.bf16.mxu1 %v1782_v5 }
 0x670   :  { %v484_v27 = vpop.f32.mrb[2].mxu1 }
 0x671   :  { %v489_v29 = vrot.slane %v484_v27, 1  ;;  %v492_v30 = vadd.f32 %v484_v27, %v410_v25  ;;  %v1527_v31 = vpop.f32.mrb[3].mxu1 }
 0x673   :  { %v493_v33 = vadd.f32 %v489_v29, %v411_v32  ;;  %1684 = vtanh.f32 %v492_v30 }
 0x675   :  { %1686 = vtanh.f32 %v493_v33 }
 0x67d   :  { %v1685_v34 = vpop.eup %1684 }
 0x67e   :  { %v496_v35 = vmul.f32 %v1685_v34, %v1891_v26 }
 0x67f   :  { %v1687_v36 = vpop.eup %1686 }
 0x680   :  { %v498_v37 = vadd.f32 %v496_v35, %v1893_v28  ;;  %v497_v38 = vmul.f32 %v1687_v36, %v1891_v26 }
 0x682   :  { %504 = vrot.lane.b32.xlu1 %v498_v37, %s1786_s3  ;;  %v499_v39 = vadd.f32 %v497_v38, %v1893_v28  ;;  %v500_v44 = vmul.f32 %v498_v37, %v386_v12 }
 0x684   :  { %506 = vrot.lane.b32.xlu0 %v499_v39, %s1786_s3  ;;  %v501_v48 = vmul.f32 %v499_v39, %v387_v15 }
 0x6f4   :  { %v505_v40 = vpop.permute.xlu1 %504 }
 0x6f5   :  { %v510_v41 = vmul.f32 %v505_v40, %v498_v37 }
 0x6f6   :  { %v507_v42 = vpop.permute.xlu0 %506 }
 0x6f7   :  { %v511_v43 = vmul.f32 %v507_v42, %v499_v39  ;;  %514 = vrot.lane.b32.xlu1 %v510_v41, %s1787_s22  ;;  %v679_v42 = vld [vmem:[#allocation2 + $0xc] sm:$0x1] }
 0x6f9   :  { %516 = vrot.lane.b32.xlu0 %v511_v43, %s1787_s22 }
 0x769   :  { %v515_v45 = vpop.permute.xlu1 %514 }
 0x76a   :  { %v520_v46 = vadd.f32 %v515_v45, %v500_v44 }
 0x76b   :  { %v517_v49 = vpop.permute.xlu0 %516 }
 0x76c   :  { %1688 = vtanh.f32 %v520_v46  ;;  %v521_v51 = vadd.f32 %v517_v49, %v501_v48 }
 0x76e   :  { %1690 = vtanh.f32 %v521_v51 }
 0x776   :  { %v1689_v52 = vpop.eup %1688 }
 0x777   :  { %526 = vrot.lane.b32.xlu1 %v1689_v52, %s1786_s3 }
 0x778   :  { %v1691_v53 = vpop.eup %1690 }
 0x779   :  { %528 = vrot.lane.b32.xlu0 %v1691_v53, %s1786_s3 }
 0x7e9   :  { %v527_v54 = vpop.permute.xlu1 %526 }
 0x7ea   :  { %v1957_v57 = vmul.f32 %v527_v54, %v498_v37  ;;  %v678_v37 = vld [vmem:[#allocation2 + $0x4] sm:$0x1] }
 0x7eb   :  { %v529_v55 = vpop.permute.xlu0 %528 }
 0x7ec   :  { %v1955_v56 = vmul.f32 %v529_v55, %v499_v39 }
 0x7ee   :  { %v546_v58 = vrot.slane %v1955_v56, 7 }
 0x7f0   :  { %v547_v59 = vsel %vm278_vm6, %v546_v58, %v1957_v57 }
 0x7f1   :  { %548 = vrot.lane.b32.xlu0 %v547_v59, %s1787_s22 }
 0x863   :  { %v549_v60 = vpop.permute.xlu0 %548 }
 0x864   :  { %1537 = vmatmul.mubr.msk.f32.vlgmr.msra.gmra.mrb[4].mxu0 %vm144_vm7, %v549_v60 }
 0x865   :  { %1633 = vmatpush3.bf16.msra.mxu0 %v1858_v6  ;;  %1558 = vmatprep.mubr.msk.f32.mxu0 %vm1783_vm2, %v1784_v9 }
 0x866   :  { %1634 = vmatprep.subr.bf16.mxu0 %v1782_v5 }
 0x869   :  { %1636 = vmatpush3.bf16.msra.mxu0 %v1869_v10 }
 0x86a   :  { %1643 = vmatprep.subr.bf16.mxu0 %v1782_v5 }
 0x937   :  { %v618_v62 = vpop.f32.mrb[4].mxu0 }
 0x938   :  { %v623_v63 = vrot.slane %v618_v62, 1  ;;  %v626_v0 = vadd.f32 %v618_v62, %v544_v61  ;;  %v1538_v1 = vpop.f32.mrb[5].mxu0 }
 0x93a   :  { %v627_v3 = vadd.f32 %v623_v63, %v545_v2  ;;  %1692 = vtanh.f32 %v626_v0 }
 0x93c   :  { %1694 = vtanh.f32 %v627_v3 }
 0x944   :  { %v1693_v4 = vpop.eup %1692 }
 0x945   :  { %v630_v7 = vmul.f32 %v1693_v4, %v1891_v26 }
 0x946   :  { %v1695_v8 = vpop.eup %1694 }
 0x947   :  { %v632_v11 = vadd.f32 %v630_v7, %v1893_v28  ;;  %v631_v12 = vmul.f32 %v1695_v8, %v1891_v26 }
 0x949   :  { %638 = vrot.lane.b32.xlu0 %v632_v11, %s1786_s3  ;;  %v633_v13 = vadd.f32 %v631_v12, %v1893_v28  ;;  %v634_v18 = vmul.f32 %v632_v11, %v520_v46 }
 0x94b   :  { %640 = vrot.lane.b32.xlu1 %v633_v13, %s1786_s3  ;;  %v635_v23 = vmul.f32 %v633_v13, %v521_v51 }
 0x9bb   :  { %v639_v14 = vpop.permute.xlu0 %638 }
 0x9bc   :  { %v644_v15 = vmul.f32 %v639_v14, %v632_v11 }
 0x9bd   :  { %v641_v16 = vpop.permute.xlu1 %640 }
 0x9be   :  { %v645_v17 = vmul.f32 %v641_v16, %v633_v13  ;;  %648 = vrot.lane.b32.xlu0 %v644_v15, %s1787_s22 }
 0x9c0   :  { %650 = vrot.lane.b32.xlu1 %v645_v17, %s1787_s22 }
 0xa30   :  { %v649_v19 = vpop.permute.xlu0 %648 }
 0xa31   :  { %v654_v22 = vadd.f32 %v649_v19, %v634_v18  ;;  %v813_v18 = vld [vmem:[#allocation2 + $0xd] sm:$0x1] }
 0xa32   :  { %v651_v24 = vpop.permute.xlu1 %650 }
 0xa33   :  { %1696 = vtanh.f32 %v654_v22  ;;  %v655_v25 = vadd.f32 %v651_v24, %v635_v23 }
 0xa35   :  { %1698 = vtanh.f32 %v655_v25 }
 0xa3d   :  { %v1697_v27 = vpop.eup %1696 }
 0xa3e   :  { %660 = vrot.lane.b32.xlu0 %v1697_v27, %s1786_s3 }
 0xa3f   :  { %v1699_v29 = vpop.eup %1698 }
 0xa40   :  { %662 = vrot.lane.b32.xlu1 %v1699_v29, %s1786_s3 }
 0xab0   :  { %v661_v30 = vpop.permute.xlu0 %660 }
 0xab1   :  { %v1982_v33 = vmul.f32 %v661_v30, %v632_v11 }
 0xab2   :  { %v663_v31 = vpop.permute.xlu1 %662 }
 0xab3   :  { %v1980_v32 = vmul.f32 %v663_v31, %v633_v13  ;;  %v812_v13 = vld [vmem:[#allocation2 + $0x5] sm:$0x1] }
 0xab5   :  { %v680_v34 = vrot.slane %v1980_v32, 7 }
 0xab7   :  { %v681_v35 = vsel %vm278_vm6, %v680_v34, %v1982_v33 }
 0xab8   :  { %682 = vrot.lane.b32.xlu1 %v681_v35, %s1787_s22 }
 0xb2a   :  { %v683_v36 = vpop.permute.xlu1 %682 }
 0xb2b   :  { %1548 = vmatmul.mubr.msk.f32.vlgmr.msra.gmra.mrb[4].mxu1 %vm144_vm7, %v683_v36 }
 0xb2c   :  { %1639 = vmatpush3.bf16.msra.mxu1 %v1858_v6  ;;  %1569 = vmatprep.mubr.msk.f32.mxu1 %vm1783_vm2, %v1784_v9 }
 0xb2d   :  { %1640 = vmatprep.subr.bf16.mxu1 %v1782_v5 }
 0xb30   :  { %1642 = vmatpush3.bf16.msra.mxu1 %v1869_v10 }
 0xb31   :  { %1649 = vmatprep.subr.bf16.mxu1 %v1782_v5 }
 0xbfe   :  { %v752_v38 = vpop.f32.mrb[4].mxu1 }
 0xbff   :  { %v757_v39 = vrot.slane %v752_v38, 1  ;;  %v760_v40 = vadd.f32 %v752_v38, %v678_v37  ;;  %v1549_v41 = vpop.f32.mrb[5].mxu1 }
 0xc01   :  { %v761_v43 = vadd.f32 %v757_v39, %v679_v42  ;;  %1700 = vtanh.f32 %v760_v40 }
 0xc03   :  { %1702 = vtanh.f32 %v761_v43 }
 0xc0b   :  { %v1701_v44 = vpop.eup %1700 }
 0xc0c   :  { %v764_v45 = vmul.f32 %v1701_v44, %v1891_v26 }
 0xc0d   :  { %v1703_v46 = vpop.eup %1702 }
 0xc0e   :  { %v766_v48 = vadd.f32 %v764_v45, %v1893_v28  ;;  %v765_v49 = vmul.f32 %v1703_v46, %v1891_v26 }
 0xc10   :  { %772 = vrot.lane.b32.xlu1 %v766_v48, %s1786_s3  ;;  %v767_v51 = vadd.f32 %v765_v49, %v1893_v28  ;;  %v768_v58 = vmul.f32 %v766_v48, %v654_v22 }
 0xc12   :  { %774 = vrot.lane.b32.xlu0 %v767_v51, %s1786_s3  ;;  %v769_v61 = vmul.f32 %v767_v51, %v655_v25 }
 0xc82   :  { %v773_v52 = vpop.permute.xlu1 %772 }
 0xc83   :  { %v778_v53 = vmul.f32 %v773_v52, %v766_v48 }
 0xc84   :  { %v775_v54 = vpop.permute.xlu0 %774 }
 0xc85   :  { %v779_v55 = vmul.f32 %v775_v54, %v767_v51  ;;  %782 = vrot.lane.b32.xlu1 %v778_v53, %s1787_s22 }
 0xc87   :  { %784 = vrot.lane.b32.xlu0 %v779_v55, %s1787_s22 }
 0xcf7   :  { %v783_v59 = vpop.permute.xlu1 %782 }
 0xcf8   :  { %v788_v60 = vadd.f32 %v783_v59, %v768_v58  ;;  %v947_v58 = vld [vmem:[#allocation2 + $0xe] sm:$0x1] }
 0xcf9   :  { %v785_v62 = vpop.permute.xlu0 %784 }
 0xcfa   :  { %1704 = vtanh.f32 %v788_v60  ;;  %v789_v63 = vadd.f32 %v785_v62, %v769_v61 }
 0xcfc   :  { %1706 = vtanh.f32 %v789_v63 }
 0xd04   :  { %v1705_v0 = vpop.eup %1704 }
 0xd05   :  { %794 = vrot.lane.b32.xlu1 %v1705_v0, %s1786_s3 }
 0xd06   :  { %v1707_v1 = vpop.eup %1706 }
 0xd07   :  { %796 = vrot.lane.b32.xlu0 %v1707_v1, %s1786_s3 }
 0xd77   :  { %v795_v2 = vpop.permute.xlu1 %794 }
 0xd78   :  { %v2007_v7 = vmul.f32 %v795_v2, %v766_v48 }
 0xd79   :  { %v797_v3 = vpop.permute.xlu0 %796 }
 0xd7a   :  { %v2005_v4 = vmul.f32 %v797_v3, %v767_v51  ;;  %v946_v51 = vld [vmem:[#allocation2 + $0x6] sm:$0x1] }
 0xd7c   :  { %v814_v8 = vrot.slane %v2005_v4, 7 }
 0xd7e   :  { %v815_v11 = vsel %vm278_vm6, %v814_v8, %v2007_v7 }
 0xd7f   :  { %816 = vrot.lane.b32.xlu0 %v815_v11, %s1787_s22 }
 0xdf1   :  { %v817_v12 = vpop.permute.xlu0 %816 }
 0xdf2   :  { %1559 = vmatmul.mubr.msk.f32.vlgmr.msra.gmra.mrb[6].mxu0 %vm144_vm7, %v817_v12 }
 0xdf3   :  { %1645 = vmatpush3.bf16.msra.mxu0 %v1858_v6  ;;  %1580 = vmatprep.mubr.msk.f32.mxu0 %vm1783_vm2, %v1784_v9 }
 0xdf4   :  { %1646 = vmatprep.subr.bf16.mxu0 %v1782_v5 }
 0xdf7   :  { %1648 = vmatpush3.bf16.msra.mxu0 %v1869_v10 }
 0xdf8   :  { %1655 = vmatprep.subr.bf16.mxu0 %v1782_v5 }
 0xec5   :  { %v886_v14 = vpop.f32.mrb[6].mxu0 }
 0xec6   :  { %v891_v15 = vrot.slane %v886_v14, 1  ;;  %v894_v16 = vadd.f32 %v886_v14, %v812_v13  ;;  %v1560_v17 = vpop.f32.mrb[7].mxu0 }
 0xec8   :  { %v895_v19 = vadd.f32 %v891_v15, %v813_v18  ;;  %1708 = vtanh.f32 %v894_v16 }
 0xeca   :  { %1710 = vtanh.f32 %v895_v19 }
 0xed2   :  { %v1709_v22 = vpop.eup %1708 }
 0xed3   :  { %v898_v6 = vmul.f32 %v1709_v22, %v1891_v26 }
 0xed4   :  { %v1711_v23 = vpop.eup %1710 }
 0xed5   :  { %v900_v24 = vadd.f32 %v898_v6, %v1893_v28  ;;  %v899_v25 = vmul.f32 %v1711_v23, %v1891_v26 }
 0xed7   :  { %906 = vrot.lane.b32.xlu0 %v900_v24, %s1786_s3  ;;  %v901_v10 = vadd.f32 %v899_v25, %v1893_v28  ;;  %v902_v34 = vmul.f32 %v900_v24, %v788_v60 }
 0xed9   :  { %908 = vrot.lane.b32.xlu1 %v901_v10, %s1786_s3  ;;  %v903_v37 = vmul.f32 %v901_v10, %v789_v63 }
 0xf49   :  { %v907_v27 = vpop.permute.xlu0 %906 }
 0xf4a   :  { %v912_v29 = vmul.f32 %v907_v27, %v900_v24 }
 0xf4b   :  { %v909_v30 = vpop.permute.xlu1 %908 }
 0xf4c   :  { %v913_v31 = vmul.f32 %v909_v30, %v901_v10  ;;  %916 = vrot.lane.b32.xlu0 %v912_v29, %s1787_s22  ;;  %v1080_v29 = vld [vmem:[#allocation2 + $0x7] sm:$0x1] }
 0xf4e   :  { %918 = vrot.lane.b32.xlu1 %v913_v31, %s1787_s22 }
 0xfbe   :  { %v917_v35 = vpop.permute.xlu0 %916 }
 0xfbf   :  { %v922_v36 = vadd.f32 %v917_v35, %v902_v34 }
 0xfc0   :  { %v919_v38 = vpop.permute.xlu1 %918 }
 0xfc1   :  { %1712 = vtanh.f32 %v922_v36  ;;  %v923_v39 = vadd.f32 %v919_v38, %v903_v37 }
 0xfc3   :  { %1714 = vtanh.f32 %v923_v39 }
 0xfcb   :  { %v1713_v40 = vpop.eup %1712 }
 0xfcc   :  { %928 = vrot.lane.b32.xlu0 %v1713_v40, %s1786_s3 }
 0xfcd   :  { %v1715_v41 = vpop.eup %1714 }
 0xfce   :  { %930 = vrot.lane.b32.xlu1 %v1715_v41, %s1786_s3 }
0x103e   :  { %v929_v42 = vpop.permute.xlu0 %928 }
0x103f   :  { %v2032_v45 = vmul.f32 %v929_v42, %v900_v24 }
0x1040   :  { %v931_v43 = vpop.permute.xlu1 %930 }
0x1041   :  { %v2030_v44 = vmul.f32 %v931_v43, %v901_v10 }
0x1043   :  { %v948_v46 = vrot.slane %v2030_v44, 7 }
0x1045   :  { %v949_v48 = vsel %vm278_vm6, %v948_v46, %v2032_v45 }
0x1046   :  { %950 = vrot.lane.b32.xlu1 %v949_v48, %s1787_s22 }
0x10b8   :  { %v951_v49 = vpop.permute.xlu1 %950 }
0x10b9   :  { %1570 = vmatmul.mubr.msk.f32.vlgmr.msra.gmra.mrb[6].mxu1 %vm144_vm7, %v951_v49 }
0x10ba   :  { %1591 = vmatprep.mubr.msk.f32.mxu1 %vm1783_vm2, %v1784_v9 }
0x118c   :  { %v1020_v52 = vpop.f32.mrb[6].mxu1 }
0x118d   :  { %v1025_v53 = vrot.slane %v1020_v52, 1  ;;  %v1028_v54 = vadd.f32 %v1020_v52, %v946_v51  ;;  %v1571_v55 = vpop.f32.mrb[7].mxu1 }
0x118f   :  { %v1029_v59 = vadd.f32 %v1025_v53, %v947_v58  ;;  %1716 = vtanh.f32 %v1028_v54 }
0x1191   :  { %1718 = vtanh.f32 %v1029_v59  ;;  %v1214_v59 = vld [vmem:[%s2180_s4] sm:$0xff] }
0x1199   :  { %v1717_v60 = vpop.eup %1716 }
0x119a   :  { %v1032_v61 = vmul.f32 %v1717_v60, %v1891_v26  ;;  %v1215_v60 = vld [vmem:[%s2180_s4 + $0x8] sm:$0xff] }
0x119b   :  { %v1719_v62 = vpop.eup %1718 }
0x119c   :  { %v1034_v63 = vadd.f32 %v1032_v61, %v1893_v28  ;;  %v1033_v0 = vmul.f32 %v1719_v62, %v1891_v26  ;;  %v1216_v61 = vld [vmem:[%s2180_s4 + $0x10] sm:$0xff]  ;;  %v1650_v62 = vpack.c.bf16 %v1215_v60, %v1214_v59 }
0x119e   :  { %1040 = vrot.lane.b32.xlu1 %v1034_v63, %s1786_s3  ;;  %v1035_v1 = vadd.f32 %v1033_v0, %v1893_v28  ;;  %v1036_v12 = vmul.f32 %v1034_v63, %v922_v36  ;;  %v1081_v36 = vld [vmem:[#allocation2 + $0xf] sm:$0x1]  ;;  %1651 = vmatpush3.bf16.msra.mxu1 %v1650_v62 }
0x119f   :  { %1652 = vmatprep.subr.bf16.mxu1 %v1782_v5 }
0x11a0   :  { %1042 = vrot.lane.b32.xlu0 %v1035_v1, %s1786_s3  ;;  %v1037_v15 = vmul.f32 %v1035_v1, %v923_v39 }
0x1210   :  { %v1041_v2 = vpop.permute.xlu1 %1040 }
0x1211   :  { %v1046_v3 = vmul.f32 %v1041_v2, %v1034_v63 }
0x1212   :  { %v1043_v8 = vpop.permute.xlu0 %1042 }
0x1213   :  { %v1047_v11 = vmul.f32 %v1043_v8, %v1035_v1  ;;  %1050 = vrot.lane.b32.xlu1 %v1046_v3, %s1787_s22 }
0x1215   :  { %1052 = vrot.lane.b32.xlu0 %v1047_v11, %s1787_s22 }
0x1285   :  { %v1051_v13 = vpop.permute.xlu1 %1050 }
0x1286   :  { %v1056_v14 = vadd.f32 %v1051_v13, %v1036_v12 }
0x1287   :  { %v1053_v16 = vpop.permute.xlu0 %1052 }
0x1288   :  { %1720 = vtanh.f32 %v1056_v14  ;;  %v1057_v17 = vadd.f32 %v1053_v16, %v1037_v15  ;;  %v1302_v16 = vld [vmem:[%s2182_s6] sm:$0xff] }
0x128a   :  { %1722 = vtanh.f32 %v1057_v17 }
0x1292   :  { %v1721_v18 = vpop.eup %1720 }
0x1293   :  { %1062 = vrot.lane.b32.xlu1 %v1721_v18, %s1786_s3 }
0x1294   :  { %v1723_v19 = vpop.eup %1722 }
0x1295   :  { %1064 = vrot.lane.b32.xlu0 %v1723_v19, %s1786_s3  ;;  %v1435_v19 = vld [vmem:[%s2181_s5] ss:$0 sm:$0xff]  ;;  %s1788_s5 = smov [#allocation3]  }
0x1305   :  { %v1063_v22 = vpop.permute.xlu1 %1062 }
0x1306   :  { %v2053_v24 = vmul.f32 %v1063_v22, %v1034_v63  ;;  %v1217_v63 = vld [vmem:[%s2180_s4 + $0x18] sm:$0xff] }
0x1307   :  { %v1065_v6 = vpop.permute.xlu0 %1064  ;;  %v1653_v0 = vpack.c.bf16 %v1217_v63, %v1216_v61 }
0x1308   :  { %v2051_v23 = vmul.f32 %v1065_v6, %v1035_v1 }
0x1309   :  { %1654 = vmatpush3.bf16.msra.mxu1 %v1653_v0 }
0x130a   :  { %v1082_v25 = vrot.slane %v2051_v23, 7 }
0x130c   :  { %v1083_v10 = vsel %vm278_vm6, %v1082_v25, %v2053_v24  ;;  %v1437_v25 = vld [vmem:[%s2183_s7] ss:$0 sm:$0xff] }
0x130d   :  { %1084 = vrot.lane.b32.xlu0 %v1083_v10, %s1787_s22 }
0x137f   :  { %v1085_v27 = vpop.permute.xlu0 %1084 }
0x1380   :  { %1581 = vmatmul.mubr.msk.f32.vlgmr.msra.gmra.mrb[8].mxu0 %vm144_vm7, %v1085_v27 }
0x1381   :  { %1598 = vmatprep.mubr.msk.f32.mxu0 %vm1783_vm2, %v1784_v9 }
0x1453   :  { %v1154_v30 = vpop.f32.mrb[8].mxu0 }
0x1454   :  { %v1159_v31 = vrot.slane %v1154_v30, 1  ;;  %v1162_v34 = vadd.f32 %v1154_v30, %v1080_v29  ;;  %v1582_v35 = vpop.f32.mrb[9].mxu0 }
0x1456   :  { %v1163_v37 = vadd.f32 %v1159_v31, %v1081_v36  ;;  %1724 = vtanh.f32 %v1162_v34 }
0x1458   :  { %1726 = vtanh.f32 %v1163_v37 }
0x1460   :  { %v1725_v38 = vpop.eup %1724 }
0x1461   :  { %v1166_v39 = vmul.f32 %v1725_v38, %v1891_v26 }
0x1462   :  { %v1727_v40 = vpop.eup %1726 }
0x1463   :  { %v1168_v41 = vadd.f32 %v1166_v39, %v1893_v28  ;;  %v1167_v42 = vmul.f32 %v1727_v40, %v1891_v26 }
0x1465   :  { %1174 = vrot.lane.b32.xlu0 %v1168_v41, %s1786_s3  ;;  %v1169_v9 = vadd.f32 %v1167_v42, %v1893_v28  ;;  %v1170_v51 = vmul.f32 %v1168_v41, %v1056_v14 }
0x1467   :  { %1176 = vrot.lane.b32.xlu1 %v1169_v9, %s1786_s3  ;;  %v1171_v54 = vmul.f32 %v1169_v9, %v1057_v17  ;;  %v1303_v17 = vld [vmem:[%s2182_s6 + $0x8] sm:$0xff]  ;;  %s1399_s6 = sshll.u32 %s1788_s5, 4  ;;  %s1400_s6 = int_to_ptr.vmem [resolvable:$true] %s1399_s6 }
0x1468   :  { %v1656_v18 = vpack.c.bf16 %v1303_v17, %v1302_v16  ;;  %s1734_s7 = scalar_lea.vmem %s1400_s6, 256  ;;  %p1739_p1 = scmp.lt.s32.totalorder %s1400_s6, %s1400_s6 }
0x1469   :  { %p1735_p0 = scmp.ne.s32.totalorder %s1400_s6, %s1734_s7  ;;  %p1740_p2 = scmp.lt.s32.totalorder %s1734_s7, %s1734_s7 }
0x146a   :  { %1657 = vmatpush3.bf16.msra.mxu0 %v1656_v18 }
0x146b   :  { %p1741_p3 = por %p1740_p2, %p1739_p1 }
0x146d   :  { %p1742_p4 = pnand %p1741_p3, %p1735_p0 }
0x14d7   :  { %v1175_v43 = vpop.permute.xlu0 %1174 }
0x14d8   :  { %v1180_v46 = vmul.f32 %v1175_v43, %v1168_v41 }
0x14d9   :  { %v1177_v48 = vpop.permute.xlu1 %1176 }
0x14da   :  { %v1181_v49 = vmul.f32 %v1177_v48, %v1169_v9  ;;  %1184 = vrot.lane.b32.xlu0 %v1180_v46, %s1787_s22 }
0x14dc   :  { %1186 = vrot.lane.b32.xlu1 %v1181_v49, %s1787_s22 }
0x154c   :  { %v1185_v52 = vpop.permute.xlu0 %1184 }
0x154d   :  { %v1190_v53 = vadd.f32 %v1185_v52, %v1170_v51 }
0x154e   :  { %v1187_v55 = vpop.permute.xlu1 %1186 }
0x154f   :  { %1728 = vtanh.f32 %v1190_v53  ;;  %v1191_v26 = vadd.f32 %v1187_v55, %v1171_v54 }
0x1551   :  { %1730 = vtanh.f32 %v1191_v26 }
0x1559   :  { %v1729_v58 = vpop.eup %1728 }
0x155a   :  { %1196 = vrot.lane.b32.xlu0 %v1729_v58, %s1786_s3 }
0x155b   :  { %v1731_v28 = vpop.eup %1730 }
0x155c   :  { %1198 = vrot.lane.b32.xlu1 %v1731_v28, %s1786_s3 }
0x155e   :  { %804 = vrot.lane.b32.xlu0 %v2007_v7, %s1787_s22 }
0x15cc   :  { %v1197_v7 = vpop.permute.xlu0 %1196 }
0x15cd   :  { %v1202_v8 = vmul.f32 %v1197_v7, %v1168_v41 }
0x15ce   :  { %v1199_v1 = vpop.permute.xlu1 %1198 }
0x15cf   :  { %v2087_v2 = vmul.f32 %v1199_v1, %v1169_v9 }
0x15d0   :  { %v805_v3 = vpop.permute.xlu0 %804 }
0x15d1   :  { %v1225_v11 = vrot.slane %v2087_v2, 7  ;;  %810 = vst.msk [vmem:[#allocation3 + $0x4] sm:$0x1] %vm272_vm8, %v805_v3 }
0x15d3   :  { %v1226_v12 = vsel %vm278_vm6, %v1225_v11, %v1202_v8 }
0x15d4   :  { %1227 = vrot.lane.b32.xlu1 %v1226_v12, %s1787_s22 }
0x15d8   :  { %266 = vrot.lane.b32.xlu1 %v1908_v50, %s1787_s22 }
0x15dc   :  { %268 = vrot.lane.b32.xlu1 %v1905_v47, %s1787_s22 }
0x15e0   :  { %402 = vrot.lane.b32.xlu1 %v1932_v21, %s1787_s22 }
0x15e4   :  { %404 = vrot.lane.b32.xlu1 %v1930_v20, %s1787_s22 }
0x15e8   :  { %536 = vrot.lane.b32.xlu1 %v1957_v57, %s1787_s22 }
0x15ec   :  { %538 = vrot.lane.b32.xlu1 %v1955_v56, %s1787_s22 }
0x15f0   :  { %670 = vrot.lane.b32.xlu1 %v1982_v33, %s1787_s22 }
0x15f4   :  { %672 = vrot.lane.b32.xlu1 %v1980_v32, %s1787_s22 }
0x15f8   :  { %806 = vrot.lane.b32.xlu1 %v2005_v4, %s1787_s22 }
0x15fc   :  { %938 = vrot.lane.b32.xlu1 %v2032_v45, %s1787_s22 }
0x1600   :  { %940 = vrot.lane.b32.xlu1 %v2030_v44, %s1787_s22 }
0x1604   :  { %1072 = vrot.lane.b32.xlu1 %v2053_v24, %s1787_s22 }
0x1608   :  { %1074 = vrot.lane.b32.xlu1 %v2051_v23, %s1787_s22 }
0x160c   :  { %1206 = vrot.lane.b32.xlu1 %v1202_v8, %s1787_s22 }
0x1646   :  { %v1228_v5 = vpop.permute.xlu1 %1227 }
0x1647   :  { %1592 = vmatmul.mubr.msk.f32.vlgmr.msra.gmra.mrb[8].mxu1 %vm144_vm7, %v1228_v5 }
0x164a   :  { %v267_v47 = vpop.permute.xlu1 %266 }
0x164b   :  { %273 = vst.msk [vmem:[#allocation3] sm:$0x1] %vm272_vm8, %v267_v47 }
0x164e   :  { %v269_v50 = vpop.permute.xlu1 %268 }
0x164f   :  { %274 = vst.msk [vmem:[#allocation3 + $0x8] sm:$0x1] %vm272_vm8, %v269_v50 }
0x1652   :  { %v403_v20 = vpop.permute.xlu1 %402 }
0x1653   :  { %408 = vst.msk [vmem:[#allocation3 + $0x1] sm:$0x1] %vm272_vm8, %v403_v20 }
0x1656   :  { %v405_v21 = vpop.permute.xlu1 %404 }
0x1657   :  { %409 = vst.msk [vmem:[#allocation3 + $0x9] sm:$0x1] %vm272_vm8, %v405_v21 }
0x165a   :  { %v537_v56 = vpop.permute.xlu1 %536 }
0x165b   :  { %542 = vst.msk [vmem:[#allocation3 + $0x2] sm:$0x1] %vm272_vm8, %v537_v56 }
0x165e   :  { %v539_v57 = vpop.permute.xlu1 %538 }
0x165f   :  { %543 = vst.msk [vmem:[#allocation3 + $0xa] sm:$0x1] %vm272_vm8, %v539_v57 }
0x1662   :  { %v671_v32 = vpop.permute.xlu1 %670 }
0x1663   :  { %676 = vst.msk [vmem:[#allocation3 + $0x3] sm:$0x1] %vm272_vm8, %v671_v32 }
0x1666   :  { %v673_v33 = vpop.permute.xlu1 %672 }
0x1667   :  { %677 = vst.msk [vmem:[#allocation3 + $0xb] sm:$0x1] %vm272_vm8, %v673_v33 }
0x166a   :  { %v807_v4 = vpop.permute.xlu1 %806 }
0x166b   :  { %811 = vst.msk [vmem:[#allocation3 + $0xc] sm:$0x1] %vm272_vm8, %v807_v4 }
0x166e   :  { %v939_v44 = vpop.permute.xlu1 %938 }
0x166f   :  { %944 = vst.msk [vmem:[#allocation3 + $0x5] sm:$0x1] %vm272_vm8, %v939_v44 }
0x1672   :  { %v941_v45 = vpop.permute.xlu1 %940 }
0x1673   :  { %945 = vst.msk [vmem:[#allocation3 + $0xd] sm:$0x1] %vm272_vm8, %v941_v45 }
0x1676   :  { %v1073_v13 = vpop.permute.xlu1 %1072 }
0x1677   :  { %1078 = vst.msk [vmem:[#allocation3 + $0x6] sm:$0x1] %vm272_vm8, %v1073_v13 }
0x167a   :  { %v1075_v14 = vpop.permute.xlu1 %1074 }
0x167b   :  { %1079 = vst.msk [vmem:[#allocation3 + $0xe] sm:$0x1] %vm272_vm8, %v1075_v14 }
0x167e   :  { %v1207_v15 = vpop.permute.xlu1 %1206 }
0x167f   :  { %1212 = vst.msk [vmem:[#allocation3 + $0x7] sm:$0x1] %vm272_vm8, %v1207_v15 }
0x171a   :  { %v1297_v22 = vpop.f32.mrb[8].mxu1 }
0x171b   :  { %v1298_v6 = vadd.f32 %v1435_v19, %v1297_v22  ;;  %v1593_v23 = vpop.f32.mrb[9].mxu1 }
0x171d   :  { %v1301_v24 = vmax.f32 %v1298_v6, 0.0 }
0x171f   :  { %1599 = vmatmul.mubr.msk.f32.vlgmr.msra.gmra.mrb[10].mxu0 %vm1311_vm9, %v1301_v24 }
0x17f2   :  { %v1381_v10 = vpop.f32.mrb[10].mxu0 }
0x17f3   :  { %v1382_v27 = vadd.f32 %v1437_v25, %v1381_v10  ;;  %v1600_v29 = vpop.f32.mrb[11].mxu0 }
0x17f5   :  { %v1385_v30 = vmul.f32 %v1382_v27, %v1382_v27 }
0x17f7   :  { %v1387_v31 = vsel %vm1386_vm10, %v1385_v30, 0.0 }
0x17f8   :  { %1388 = vadd.xlane.f32.xlu0 %v1387_v31 }
0x180e   :  { %1208 = vrot.lane.b32.xlu0 %v2087_v2, %s1787_s22 }
0x1885   :  { %v1389_v34 = vpop.xlane.xlu0 %1388 }
0x1886   :  { %v1390_v35 = vmax.f32 %v1389_v34, 1e-24 }
0x1888   :  { %1732 = vrsqrt.f32 %v1390_v35 }
0x1889   :  { %v1209_v36 = vpop.permute.xlu0 %1208 }
0x188a   :  { %1213 = vst.msk [vmem:[#allocation3 + $0xf] sm:$0x1] %vm272_vm8, %v1209_v36 }
0x188b   :  { %1745 = shalt.err (!%p1742_p4)
}
0x188c   :  { %s1746_s1 = scalar_lea.hbm %s2184_s8, 256 }
0x188d   :  { %p1747_p5 = scmp.ne.s32.totalorder %s2184_s8, %s1746_s1  ;;  %p1750_p6 = scmp.lt.u32.totalorder %s1746_s1, %s2184_s8 }
0x188f   :  { %p1752_p7 = pnand %p1750_p6, %p1747_p5 }
0x1891   :  { %1755 = shalt.err (!%p1752_p7)
}
0x1892   :  { %s1789_s21 = smov 128   ;;  %s1790_s3 = smov 8   ;;  %v1733_v37 = vpop.eup %1732 }
0x1893   :  { %1405 = dma.vmem_to_hbm [thread:$0]  %s1400_s6, 256, %s2184_s8, [#allocation4], %s1789_s21, %s1789_s21, %s1790_s3   ;;  %v1392_v38 = vmul.f32 %v1733_v37, %v1382_v27 }
0x1894   :  { %s1791_s24 = smov [#allocation5]  }
0x1895   :  { %s1412_s25 = sshll.u32 %s1791_s24, 4  ;;  %1393 = vst.msk [vmem:[#allocation5] sm:$0x3] %vm1386_vm10, %v1392_v38  ;;  %s1413_s25 = int_to_ptr.vmem [resolvable:$true] %s1412_s25 }
0x1896   :  { %s1756_s26 = scalar_lea.vmem %s1413_s25, 32  ;;  %p1761_p9 = scmp.lt.s32.totalorder %s1413_s25, %s1413_s25 }
0x1897   :  { %p1757_p8 = scmp.ne.s32.totalorder %s1413_s25, %s1756_s26  ;;  %p1762_p10 = scmp.lt.s32.totalorder %s1756_s26, %s1756_s26 }
0x1899   :  { %p1763_p11 = por %p1762_p10, %p1761_p9 }
0x189b   :  { %p1764_p12 = pnand %p1763_p11, %p1757_p8 }
0x189d   :  { %1767 = shalt.err (!%p1764_p12)
}
0x189e   :  { %s1768_s29 = scalar_lea.hbm %s2185_s9, 32 }
0x189f   :  { %p1769_p13 = scmp.ne.s32.totalorder %s2185_s9, %s1768_s29  ;;  %p1772_p0 = scmp.lt.u32.totalorder %s1768_s29, %s2185_s9 }
0x18a1   :  { %p1774_p1 = pnand %p1772_p0, %p1769_p13 }
0x18a3   :  { %1777 = shalt.err (!%p1774_p1)
}
0x18a4   :  { %1415 = dma.vmem_to_hbm [thread:$0]  %s1413_s25, 32, %s2185_s9, [#allocation6]  }
0x18a5   :  { %1778 = dma.done.wait [#allocation4], 256  }
0x18a6   :  { %1779 = vsyncadd [#allocation4], 4294967040 }
0x18a7   :  { %1780 = dma.done.wait [#allocation6], 32  }
0x18a8   :  { %1781 = vsyncadd [#allocation6], 4294967264 }
0x18a9   :  { %1422 = vsyncpa [#allocation4], 1 }
0x18aa   :  { %1423 = vsyncpa [#allocation6], 1 }

</bundles_post_ra>
